<compile_context>
chip_gen: v7x
topology: tpu7x:2x2x1
jax: 0.10.0
libtpu: 0.0.40
codegen_flags: <defaults>
</compile_context>

<pallas_src>
import functools

import jax
import jax.numpy as jnp
from jax.experimental import pallas as pl
from jax.experimental.pallas import tpu as pltpu


def _cast(v, dt):
    return v if (dt is None or v.dtype == dt) else v.astype(dt)


def _resident_kernel(x_ref, w1_ref, b1_ref, w2_ref, b2_ref, o_ref, *, mxu_dtype):
    # x: (TM, F)  w1: (F, H)  b1: (1, H)  w2: (H, H)  b2: (1, H)  o: (TM, H)
    # linear1 (MXU, f32 accumulation) + bias + ReLU
    h = jnp.dot(_cast(x_ref[...], mxu_dtype), _cast(w1_ref[...], mxu_dtype),
                preferred_element_type=jnp.float32)
    h = jnp.maximum(h + b1_ref[...].astype(jnp.float32), 0.0)
    w2 = _cast(w2_ref[...], mxu_dtype)
    h = _cast(h, w2.dtype)
    # linear2 (MXU, f32 accumulation); bias + residual + final ReLU fused into
    # one VPU epilogue pass over the tile.
    y = jnp.dot(h, w2, preferred_element_type=jnp.float32)
    # Residual add re-reads x_ref here (x tile is VMEM-resident anyway) instead
    # of holding the loaded x live across both matmuls -> lower vreg pressure.
    y = y + b2_ref[...].astype(jnp.float32) + x_ref[...].astype(jnp.float32)
    o_ref[...] = jnp.maximum(y, 0.0).astype(o_ref.dtype)


def _ktiled_kernel(x_ref, w1_ref, b1_ref, w2_ref, b2_ref, o_ref, acc_ref, *, mxu_dtype):
    # x: (TM, F)  w1: (F, TK)  b1: (1, TK)  w2: (TK, H)  b2: (1, H)
    # o: (TM, H)  acc: (TM, H) f32 scratch
    k = pl.program_id(1)

    @pl.when(k == 0)
    def _():
        acc_ref[...] = jnp.zeros_like(acc_ref)

    h = jnp.dot(_cast(x_ref[...], mxu_dtype), _cast(w1_ref[...], mxu_dtype),
                preferred_element_type=jnp.float32)
    h = jnp.maximum(h + b1_ref[...].astype(jnp.float32), 0.0)
    w2 = _cast(w2_ref[...], mxu_dtype)
    h = _cast(h, w2.dtype)
    acc_ref[...] += jnp.dot(h, w2, preferred_element_type=jnp.float32)

    @pl.when(k == pl.num_programs(1) - 1)
    def _():
        y = acc_ref[...] + b2_ref[...].astype(jnp.float32) + x_ref[...].astype(jnp.float32)
        o_ref[...] = jnp.maximum(y, 0.0).astype(o_ref.dtype)


def _pick_batch_tile(batch):
    """Largest sublane-aligned (multiple-of-8) tile that yields >= 2 grid steps
    (DMA/compute overlap + v7x megacore sharding); falls back to a masked last
    tile (via cdiv grid) for awkward / prime batch sizes."""
    if batch <= 8:
        return batch                              # single full-extent block
    limit = min(512, max(8, batch // 2))
    limit -= limit % 8
    for t in range(limit, 7, -8):                 # prefer an evenly dividing tile
        if batch % t == 0:
            return t
    return max(8, limit)                          # masked last tile


def _vmem_cap_bytes():
    """Generation-aware VMEM budget (≈80% of physical, >=16 MiB)."""
    try:
        info = pltpu.get_tpu_info()
        cap = int(getattr(info, "vmem_capacity_bytes", 64 << 20))
    except Exception:
        cap = 64 << 20                            # conservative (v7x physical)
    return max(16 << 20, int(cap * 0.8))


def residual_block(x, w1, b1, w2, b2, *, tm=None, mxu_dtype=None, force_k_tiled=False):
    """Fused ResidualBlock forward.

    x: (B, F); w1: (F, H); b1: (H,); w2: (H, H); b2: (H,).  Requires F == H
    (the PyTorch module's residual add implies in_features == out_features).
    mxu_dtype: optionally cast matmul operands (e.g. jnp.bfloat16) to feed the
    native bf16 MXU on v5e/v6e/v7x; loosen comparison tolerances accordingly.
    """
    B, F = x.shape
    H = w1.shape[1]
    assert F == H, "residual add requires in_features == out_features"
    assert w1.shape == (F, H) and w2.shape == (H, H)
    assert b1.shape == (H,) and b2.shape == (H,)

    if tm is None:
        tm = _pick_batch_tile(B)
    tm = min(tm, B)
    b1r = b1.reshape(1, H)
    b2r = b2.reshape(1, H)

    act_bytes = jnp.dtype(x.dtype).itemsize
    w_bytes = jnp.dtype(w1.dtype).itemsize
    vmem_cap = _vmem_cap_bytes()

    cost = pl.CostEstimate(
        flops=2 * 2 * B * F * H,                  # two (B,F)@(F,H) matmuls
        transcendentals=0,
        bytes_accessed=(B * F + B * H) * act_bytes
        + (F * H + H * H + 2 * H) * w_bytes,
    )

    # Resident-path footprint: single-buffered weights/biases + double-buffered
    # x / o tiles + f32 temporaries + margin.
    resident_weight_vmem = (F * H + H * H + 2 * H) * w_bytes
    resident_needed = (resident_weight_vmem
                       + 2 * 2 * tm * H * act_bytes
                       + 2 * tm * H * 4
                       + (2 << 20))

    k_tileable = (H % 128 == 0)
    use_k_tiled = force_k_tiled or (resident_needed > vmem_cap and k_tileable)

    if not use_k_tiled:
        # ---------------- weights-resident fast path ----------------
        vmem_limit = int(min(max(resident_needed, 16 << 20), vmem_cap))
        grid = (pl.cdiv(B, tm),)

        def build(single_buffer_weights):
            # Weights/biases are revisited with a constant index_map -> one DMA.
            # Buffered(1) drops the useless second buffer (halves their VMEM).
            wmode = {"pipeline_mode": pl.Buffered(1)} if single_buffer_weights else {}
            return pl.pallas_call(
                functools.partial(_resident_kernel, mxu_dtype=mxu_dtype),
                out_shape=jax.ShapeDtypeStruct((B, H), x.dtype),
                grid=grid,
                in_specs=[
                    # x tile: pipelined (default double-buffered; on v5e/v6e a
                    # pl.Buffered(3) here can close residual DMA bubbles).
                    pl.BlockSpec((tm, F), lambda i: (i, 0)),
                    pl.BlockSpec((F, H), lambda i: (0, 0), **wmode),  # w1 resident
                    pl.BlockSpec((1, H), lambda i: (0, 0), **wmode),  # b1 resident
                    pl.BlockSpec((H, H), lambda i: (0, 0), **wmode),  # w2 resident
                    pl.BlockSpec((1, H), lambda i: (0, 0), **wmode),  # b2 resident
                ],
                out_specs=pl.BlockSpec((tm, H), lambda i: (i, 0)),
                compiler_params=pltpu.CompilerParams(
                    dimension_semantics=("parallel",),    # batch tiles independent
                    vmem_limit_bytes=vmem_limit,
                ),
                cost_estimate=cost,
            )

        try:
            return build(True)(x, w1, b1r, w2, b2r)
        except Exception:
            # Fallback if pipeline_mode / pl.Buffered is unavailable in this jax.
            return build(False)(x, w1, b1r, w2, b2r)

    # ---------------- K-tiled path (weights too big for VMEM) ----------------
    assert k_tileable, "K-tiled path requires H to be a multiple of 128"
    tk = next(t for t in (512, 256, 128) if H % t == 0)
    grid = (pl.cdiv(B, tm), H // tk)              # reduction axis last
    ktiled_needed = (2 * (F * tk + tk * H + tk) * w_bytes   # w1/b1/w2 slabs (dbl-buf)
                     + H * w_bytes                          # b2 (single-buffered)
                     + 2 * 2 * tm * H * act_bytes           # x / o tiles
                     + tm * H * 4                           # f32 accumulator
                     + tm * tk * 4                          # h temporary
                     + (2 << 20))
    vmem_limit = int(min(max(ktiled_needed, 16 << 20), vmem_cap))

    def build_kt(single_buffer_b2):
        b2mode = {"pipeline_mode": pl.Buffered(1)} if single_buffer_b2 else {}
        return pl.pallas_call(
            functools.partial(_ktiled_kernel, mxu_dtype=mxu_dtype),
            out_shape=jax.ShapeDtypeStruct((B, H), x.dtype),
            grid=grid,
            in_specs=[
                pl.BlockSpec((tm, F), lambda i, k: (i, 0)),            # x tile
                pl.BlockSpec((F, tk), lambda i, k: (0, k)),            # w1 column slab
                pl.BlockSpec((1, tk), lambda i, k: (0, k)),            # b1 slab
                pl.BlockSpec((tk, H), lambda i, k: (k, 0)),            # w2 row slab
                pl.BlockSpec((1, H), lambda i, k: (0, 0), **b2mode),   # b2 resident
            ],
            out_specs=pl.BlockSpec((tm, H), lambda i, k: (i, 0)),
            scratch_shapes=[pltpu.VMEM((tm, H), jnp.float32)],
            compiler_params=pltpu.CompilerParams(
                dimension_semantics=("parallel", "arbitrary"),
                vmem_limit_bytes=vmem_limit,
            ),
            cost_estimate=cost,
        )

    try:
        return build_kt(True)(x, w1, b1r, w2, b2r)
    except Exception:
        return build_kt(False)(x, w1, b1r, w2, b2r)


def reference(x, w1, b1, w2, b2):
    h = jnp.maximum(x @ w1 + b1, 0.0)
    y = h @ w2 + b2 + x
    return jnp.maximum(y, 0.0)


if __name__ == "__main__":
    key = jax.random.PRNGKey(0)
    B, F = 64, 256               # small demo shapes; F == H (lane-aligned)
    H = F

    k_x, k_w1, k_b1, k_w2, k_b2 = jax.random.split(key, 5)
    # PyTorch nn.Linear default init: U(-1/sqrt(fan_in), 1/sqrt(fan_in))
    bound1 = 1.0 / jnp.sqrt(F)
    bound2 = 1.0 / jnp.sqrt(H)
    x = jax.random.normal(k_x, (B, F), dtype=jnp.float32)
    w1 = jax.random.uniform(k_w1, (F, H), jnp.float32, -bound1, bound1)
    b1 = jax.random.uniform(k_b1, (H,), jnp.float32, -bound1, bound1)
    w2 = jax.random.uniform(k_w2, (H, H), jnp.float32, -bound2, bound2)
    b2 = jax.random.uniform(k_b2, (H,), jnp.float32, -bound2, bound2)

    ref = reference(x, w1, b1, w2, b2)

    # Resident (weights-in-VMEM) path: auto tm -> 32, grid=(2,), pipelined x/o.
    out = residual_block(x, w1, b1, w2, b2)
    jax.block_until_ready(out)
    assert out.shape == (B, H)
    assert jnp.allclose(out, ref, atol=1e-4, rtol=1e-4), "resident path mismatch"

    # K-tiled path (auto-selected for large H, esp. on v7x's 64 MiB VMEM);
    # force it here so the accumulator / pl.when init-finalize logic is tested.
    out_kt = residual_block(x, w1, b1, w2, b2, force_k_tiled=True)
    jax.block_until_ready(out_kt)
    assert jnp.allclose(out_kt, ref, atol=1e-4, rtol=1e-4), "k-tiled path mismatch"

    print("KERNEL_OK")
</pallas_src>

<mosaic_0001>
module attributes {stable_mosaic.version = 11 : i64} {
  func.func @_resident_kernel(%arg0: i32, %arg1: memref<32x256xf32, #tpu.memory_space<vmem>>, %arg2: memref<256x256xf32, #tpu.memory_space<vmem>>, %arg3: memref<1x256xf32, #tpu.memory_space<vmem>>, %arg4: memref<256x256xf32, #tpu.memory_space<vmem>>, %arg5: memref<1x256xf32, #tpu.memory_space<vmem>>, %arg6: memref<32x256xf32, #tpu.memory_space<vmem>>) attributes {dimension_semantics = [#tpu.dimension_semantics<parallel>], iteration_bounds = array<i64: 2>, scalar_prefetch = 0 : i64, scratch_operands = 0 : i64, tpu.core_type = #tpu.core_type<tc>, window_params = [{transform_indices = @transform_0, window_bounds = array<i64: 32, 256>}, {pipeline_mode = #tpu.pipeline_mode<synchronous>, transform_indices = @transform_1, window_bounds = array<i64: 256, 256>}, {pipeline_mode = #tpu.pipeline_mode<synchronous>, transform_indices = @transform_2, window_bounds = array<i64: 1, 256>}, {pipeline_mode = #tpu.pipeline_mode<synchronous>, transform_indices = @transform_3, window_bounds = array<i64: 256, 256>}, {pipeline_mode = #tpu.pipeline_mode<synchronous>, transform_indices = @transform_4, window_bounds = array<i64: 1, 256>}, {transform_indices = @transform_5, window_bounds = array<i64: 32, 256>}]} {
    %c0 = arith.constant 0 : index
    %c0_0 = arith.constant 0 : index
    %0 = vector.load %arg1[%c0, %c0_0] : memref<32x256xf32, #tpu.memory_space<vmem>>, vector<32x256xf32>
    %c0_1 = arith.constant 0 : index
    %c0_2 = arith.constant 0 : index
    %1 = vector.load %arg2[%c0_1, %c0_2] : memref<256x256xf32, #tpu.memory_space<vmem>>, vector<256x256xf32>
    %cst = arith.constant dense<0.000000e+00> : vector<32x256xf32>
    %2 = tpu.matmul %0, %1, %cst {dimension_numbers = #tpu.dot_dimension_numbers<[1], [0], [0], [1], [0, 0, 1, 1], [], []>} : vector<32x256xf32>, vector<256x256xf32>, vector<32x256xf32> -> vector<32x256xf32>
    %c0_3 = arith.constant 0 : index
    %c0_4 = arith.constant 0 : index
    %3 = vector.load %arg3[%c0_3, %c0_4] : memref<1x256xf32, #tpu.memory_space<vmem>>, vector<1x256xf32>
    %4 = vector.broadcast %3 : vector<1x256xf32> to vector<32x256xf32>
    %5 = arith.addf %2, %4 : vector<32x256xf32>
    %cst_5 = arith.constant 0.000000e+00 : f32
    %6 = vector.broadcast %cst_5 : f32 to vector<32x256xf32>
    %7 = arith.maximumf %5, %6 : vector<32x256xf32>
    %c0_6 = arith.constant 0 : index
    %c0_7 = arith.constant 0 : index
    %8 = vector.load %arg4[%c0_6, %c0_7] : memref<256x256xf32, #tpu.memory_space<vmem>>, vector<256x256xf32>
    %cst_8 = arith.constant dense<0.000000e+00> : vector<32x256xf32>
    %9 = tpu.matmul %7, %8, %cst_8 {dimension_numbers = #tpu.dot_dimension_numbers<[1], [0], [0], [1], [0, 0, 1, 1], [], []>} : vector<32x256xf32>, vector<256x256xf32>, vector<32x256xf32> -> vector<32x256xf32>
    %c0_9 = arith.constant 0 : index
    %c0_10 = arith.constant 0 : index
    %10 = vector.load %arg5[%c0_9, %c0_10] : memref<1x256xf32, #tpu.memory_space<vmem>>, vector<1x256xf32>
    %11 = vector.broadcast %10 : vector<1x256xf32> to vector<32x256xf32>
    %12 = arith.addf %9, %11 : vector<32x256xf32>
    %c0_11 = arith.constant 0 : index
    %c0_12 = arith.constant 0 : index
    %13 = vector.load %arg1[%c0_11, %c0_12] : memref<32x256xf32, #tpu.memory_space<vmem>>, vector<32x256xf32>
    %14 = arith.addf %12, %13 : vector<32x256xf32>
    %cst_13 = arith.constant 0.000000e+00 : f32
    %15 = vector.broadcast %cst_13 : f32 to vector<32x256xf32>
    %16 = arith.maximumf %14, %15 : vector<32x256xf32>
    %c0_14 = arith.constant 0 : index
    %c0_15 = arith.constant 0 : index
    %17 = vector.load %arg6[%c0_14, %c0_15] : memref<32x256xf32, #tpu.memory_space<vmem>>, vector<32x256xf32>
    tpu.vector_store %arg6[%c0_14, %c0_15], %16 {strides = array<i32>} : memref<32x256xf32, #tpu.memory_space<vmem>>, vector<32x256xf32>,
    return
  }
  func.func @transform_0(%arg0: i32) -> (i32, i32) {
    %c0_i32 = arith.constant 0 : i32
    %c0_i32_0 = arith.constant 0 : i32
    return %arg0, %c0_i32 : i32, i32
  }
  func.func @transform_1(%arg0: i32) -> (i32, i32) {
    %c0_i32 = arith.constant 0 : i32
    %c0_i32_0 = arith.constant 0 : i32
    %c0_i32_1 = arith.constant 0 : i32
    return %c0_i32, %c0_i32_0 : i32, i32
  }
  func.func @transform_2(%arg0: i32) -> (i32, i32) {
    %c0_i32 = arith.constant 0 : i32
    %c0_i32_0 = arith.constant 0 : i32
    %c0_i32_1 = arith.constant 0 : i32
    return %c0_i32, %c0_i32_0 : i32, i32
  }
  func.func @transform_3(%arg0: i32) -> (i32, i32) {
    %c0_i32 = arith.constant 0 : i32
    %c0_i32_0 = arith.constant 0 : i32
    %c0_i32_1 = arith.constant 0 : i32
    return %c0_i32, %c0_i32_0 : i32, i32
  }
  func.func @transform_4(%arg0: i32) -> (i32, i32) {
    %c0_i32 = arith.constant 0 : i32
    %c0_i32_0 = arith.constant 0 : i32
    %c0_i32_1 = arith.constant 0 : i32
    return %c0_i32, %c0_i32_0 : i32, i32
  }
  func.func @transform_5(%arg0: i32) -> (i32, i32) {
    %c0_i32 = arith.constant 0 : i32
    %c0_i32_0 = arith.constant 0 : i32
    return %arg0, %c0_i32 : i32, i32
  }
}

module attributes {stable_mosaic.version = 11 : i64} {
  func.func @_resident_kernel(%arg0: i32, %arg1: memref<32x256xf32, #tpu.memory_space<vmem>>, %arg2: memref<256x256xf32, #tpu.memory_space<vmem>>, %arg3: memref<1x256xf32, #tpu.memory_space<vmem>>, %arg4: memref<256x256xf32, #tpu.memory_space<vmem>>, %arg5: memref<1x256xf32, #tpu.memory_space<vmem>>, %arg6: memref<32x256xf32, #tpu.memory_space<vmem>>) attributes {dimension_semantics = [#tpu.dimension_semantics<parallel>], iteration_bounds = array<i64: 2>, scalar_prefetch = 0 : i64, scratch_operands = 0 : i64, tpu.core_type = #tpu.core_type<tc>, window_params = [{transform_indices = @transform_0, window_bounds = array<i64: 32, 256>}, {pipeline_mode = #tpu.pipeline_mode<synchronous>, transform_indices = @transform_1, window_bounds = array<i64: 256, 256>}, {pipeline_mode = #tpu.pipeline_mode<synchronous>, transform_indices = @transform_2, window_bounds = array<i64: 1, 256>}, {pipeline_mode = #tpu.pipeline_mode<synchronous>, transform_indices = @transform_3, window_bounds = array<i64: 256, 256>}, {pipeline_mode = #tpu.pipeline_mode<synchronous>, transform_indices = @transform_4, window_bounds = array<i64: 1, 256>}, {transform_indices = @transform_5, window_bounds = array<i64: 32, 256>}]} {
    %c0 = arith.constant 0 : index
    %c0_0 = arith.constant 0 : index
    %0 = vector.load %arg1[%c0, %c0_0] : memref<32x256xf32, #tpu.memory_space<vmem>>, vector<32x256xf32>
    %c0_1 = arith.constant 0 : index
    %c0_2 = arith.constant 0 : index
    %1 = vector.load %arg2[%c0_1, %c0_2] : memref<256x256xf32, #tpu.memory_space<vmem>>, vector<256x256xf32>
    %cst = arith.constant dense<0.000000e+00> : vector<32x256xf32>
    %2 = tpu.matmul %0, %1, %cst {dimension_numbers = #tpu.dot_dimension_numbers<[1], [0], [0], [1], [0, 0, 1, 1], [], []>} : vector<32x256xf32>, vector<256x256xf32>, vector<32x256xf32> -> vector<32x256xf32>
    %c0_3 = arith.constant 0 : index
    %c0_4 = arith.constant 0 : index
    %3 = vector.load %arg3[%c0_3, %c0_4] : memref<1x256xf32, #tpu.memory_space<vmem>>, vector<1x256xf32>
    %4 = vector.broadcast %3 : vector<1x256xf32> to vector<32x256xf32>
    %5 = arith.addf %2, %4 : vector<32x256xf32>
    %cst_5 = arith.constant 0.000000e+00 : f32
    %6 = vector.broadcast %cst_5 : f32 to vector<32x256xf32>
    %7 = arith.maximumf %5, %6 : vector<32x256xf32>
    %c0_6 = arith.constant 0 : index
    %c0_7 = arith.constant 0 : index
    %8 = vector.load %arg4[%c0_6, %c0_7] : memref<256x256xf32, #tpu.memory_space<vmem>>, vector<256x256xf32>
    %cst_8 = arith.constant dense<0.000000e+00> : vector<32x256xf32>
    %9 = tpu.matmul %7, %8, %cst_8 {dimension_numbers = #tpu.dot_dimension_numbers<[1], [0], [0], [1], [0, 0, 1, 1], [], []>} : vector<32x256xf32>, vector<256x256xf32>, vector<32x256xf32> -> vector<32x256xf32>
    %c0_9 = arith.constant 0 : index
    %c0_10 = arith.constant 0 : index
    %10 = vector.load %arg5[%c0_9, %c0_10] : memref<1x256xf32, #tpu.memory_space<vmem>>, vector<1x256xf32>
    %11 = vector.broadcast %10 : vector<1x256xf32> to vector<32x256xf32>
    %12 = arith.addf %9, %11 : vector<32x256xf32>
    %c0_11 = arith.constant 0 : index
    %c0_12 = arith.constant 0 : index
    %13 = vector.load %arg1[%c0_11, %c0_12] : memref<32x256xf32, #tpu.memory_space<vmem>>, vector<32x256xf32>
    %14 = arith.addf %12, %13 : vector<32x256xf32>
    %cst_13 = arith.constant 0.000000e+00 : f32
    %15 = vector.broadcast %cst_13 : f32 to vector<32x256xf32>
    %16 = arith.maximumf %14, %15 : vector<32x256xf32>
    %c0_14 = arith.constant 0 : index
    %c0_15 = arith.constant 0 : index
    %17 = vector.load %arg6[%c0_14, %c0_15] : memref<32x256xf32, #tpu.memory_space<vmem>>, vector<32x256xf32>
    tpu.vector_store %arg6[%c0_14, %c0_15], %16 {strides = array<i32>} : memref<32x256xf32, #tpu.memory_space<vmem>>, vector<32x256xf32>,
    return
  }
  func.func @transform_0(%arg0: i32) -> (i32, i32) {
    %c0_i32 = arith.constant 0 : i32
    %c0_i32_0 = arith.constant 0 : i32
    return %arg0, %c0_i32 : i32, i32
  }
  func.func @transform_1(%arg0: i32) -> (i32, i32) {
    %c0_i32 = arith.constant 0 : i32
    %c0_i32_0 = arith.constant 0 : i32
    %c0_i32_1 = arith.constant 0 : i32
    return %c0_i32, %c0_i32_0 : i32, i32
  }
  func.func @transform_2(%arg0: i32) -> (i32, i32) {
    %c0_i32 = arith.constant 0 : i32
    %c0_i32_0 = arith.constant 0 : i32
    %c0_i32_1 = arith.constant 0 : i32
    return %c0_i32, %c0_i32_0 : i32, i32
  }
  func.func @transform_3(%arg0: i32) -> (i32, i32) {
    %c0_i32 = arith.constant 0 : i32
    %c0_i32_0 = arith.constant 0 : i32
    %c0_i32_1 = arith.constant 0 : i32
    return %c0_i32, %c0_i32_0 : i32, i32
  }
  func.func @transform_4(%arg0: i32) -> (i32, i32) {
    %c0_i32 = arith.constant 0 : i32
    %c0_i32_0 = arith.constant 0 : i32
    %c0_i32_1 = arith.constant 0 : i32
    return %c0_i32, %c0_i32_0 : i32, i32
  }
  func.func @transform_5(%arg0: i32) -> (i32, i32) {
    %c0_i32 = arith.constant 0 : i32
    %c0_i32_0 = arith.constant 0 : i32
    return %arg0, %c0_i32 : i32, i32
  }
}

</mosaic_0001>

<bundles_post_ra>
// kernel: tpu_custom_call.1
= control target key start
LH: loop header
LB: loop body
LE: loop exit
PB: predicated region body
PF: predicated region fallthrough
CT: control target
= control target key end

     0   :  { %10 = vsyncpa [#allocation3], 0  ;;  %s1477_s0 = inlined_call_operand.hbm [shape: f32[64,256], index: 0, kind: input, shape index: {}]   ;;  %s1478_s1 = inlined_call_operand.hbm [shape: f32[256,256], index: 1, kind: input, shape index: {}]   ;;  %s1479_s2 = inlined_call_operand.vmem [shape: f32[1,256], index: 2, kind: input, shape index: {}]   ;;  %s1480_s3 = inlined_call_operand.hbm [shape: f32[256,256], index: 3, kind: input, shape index: {}]   ;;  %s1481_s4 = inlined_call_operand.vmem [shape: f32[1,256], index: 4, kind: input, shape index: {}]   ;;  %s1482_s5 = inlined_call_operand.hbm [shape: f32[64,256], index: 5, kind: output, shape index: {}]  }
   0x1   :  { %12 = vsyncpa [#allocation3 + $0x1], 0 }
   0x2   :  { %13 = vsyncpa [#allocation6], 0 }
   0x3   :  { %14 = vsyncpa [#allocation4], 0 }
   0x4   :  { %16 = vsyncpa [#allocation4 + $0x1], 0  ;;  %s1171_s18 = smov 0   ;;  %s1173_s19 = smov 0  }
   0x5   :  { %s1175_s20 = smov 0   ;;  %s1177_s21 = smov 0  }
   0x6 LB: > { %s1192_s22 = sadd.s32 4294967295, %s1131_s21   ;;  %s752_s23 = sadd.s32 4294967294, %s1131_s21   ;;  %s1131_s21 = sphi %s1177_s21, %s1502_s21   ;;  %s1127_s20 = sphi %s1175_s20, %s1501_s20   ;;  %s1123_s19 = sphi %s1173_s19, %s1500_s19   ;;  %s1119_s18 = sphi %s1171_s18, %s1499_s18  }
   0x7   : > { %p42_p0 = scmp.ne.s32.totalorder %s1123_s19, %s1119_s18  ;;  %p1483_p1 = scmp.eq.s32.totalorder %s1192_s22, 0 }
   0x8   : > { %p156_p3 = scmp.eq.s32.totalorder %s752_s23, 1  ;;  %p753_p5 = scmp.ge.s32.totalorder %s1131_s21, 1 }
   0x9   : > { %p1201_p4 = por %p1483_p1, %p42_p0  ;;  %p163_p7 = scmp.lt.s32.totalorder %s1131_s21, 3 }
   0xa   : > { %p1206_p6 = por %p156_p3, %p42_p0  ;;  %s1133_s27 = smov [#allocation5]  }
   0xb   : > { %s1486_s24 = scalar_select %p1201_p4, 1, 0 }
   0xc   : > { %s1487_s25 = scalar_select %p1206_p6, 1, 0 }
   0xd   : > { %p1211_p8 = pnand %p753_p5, %p163_p7  ;;  %s175_s28 = sshll.u32 %s1133_s27, 4  ;;  %s1215_s28 = int_to_ptr.vmem [resolvable:$true] %s175_s28 }
   0xe   : > { %s1134_s30 = smov [#allocation7]   ;;  %s975_s9 = scalar_lea.hbm %s1478_s1, 8192 }
   0xf   : > { %p916_p9 = pneg %p1211_p8  ;;  %s191_s6 = sshll.u32 %s1134_s30, 4  ;;  %s1226_s6 = int_to_ptr.vmem [resolvable:$true] %s191_s6 }
  0x10   : > { %p976_p12 = scmp.ne.s32.totalorder %s1478_s1, %s975_s9  ;;  %p982_p5 = scmp.lt.u32.totalorder %s975_s9, %s1478_s1 }
  0x11   : > { %p1222_p11 = pnand %p916_p9, %p1483_p1 }
  0x13   : > { %p977_p13 = pneg %p1222_p11 }
  0x15   : > { %p978_p0 = pnand %p977_p13, %p976_p12 }
  0x17   : > { %p979_p3 = pneg %p978_p0 }
  0x19   : > { %p984_p7 = pnand %p982_p5, %p979_p3 }
  0x1b   : > { %987 = shalt.err (!%p984_p7)
}
  0x1c   : > { %s988_s14 = scalar_lea.vmem %s1215_s28, 8192  ;;  %p996_p2 = scmp.lt.s32.totalorder %s1215_s28, %s1215_s28 }
  0x1d   : > { %p989_p9 = scmp.ne.s32.totalorder %s1215_s28, %s988_s14  ;;  %p997_p12 = scmp.lt.s32.totalorder %s988_s14, %s988_s14 }
  0x1f   : > { %p991_p10 = pnand %p989_p9, %p977_p13  ;;  %p998_p0 = por %p997_p12, %p996_p2 }
  0x21   : > { %p992_p1 = pneg %p991_p10 }
  0x23   : > { %p999_p6 = pnand %p998_p0, %p992_p1 }
  0x25   : > { %1002 = shalt.err (!%p999_p6)
}
  0x26   : > { %s1135_s15 = smov 256   ;;  %s1136_s16 = smov 16  }
  0x27   : > { %919 = dma.hbm_to_vmem [thread:$0]  (!%p1222_p11), %s1478_s1, 8192, %s1215_s28, [#allocation6], %s1135_s15, %s1135_s15, %s1136_s16  }
  0x28   : > { %s1003_s7 = scalar_lea.hbm %s1480_s3, 8192 }
  0x29   : > { %p1004_p1 = scmp.ne.s32.totalorder %s1480_s3, %s1003_s7  ;;  %p1010_p10 = scmp.lt.u32.totalorder %s1003_s7, %s1480_s3 }
  0x2b   : > { %p1006_p2 = pnand %p1004_p1, %p977_p13 }
  0x2d   : > { %p1007_p6 = pneg %p1006_p2 }
  0x2f   : > { %p1012_p3 = pnand %p1010_p10, %p1007_p6 }
  0x31   : > { %1015 = shalt.err (!%p1012_p3)
}
  0x32   : > { %s1016_s28 = scalar_lea.vmem %s1226_s6, 8192  ;;  %p1024_p12 = scmp.lt.s32.totalorder %s1226_s6, %s1226_s6 }
  0x33   : > { %p1017_p5 = scmp.ne.s32.totalorder %s1226_s6, %s1016_s28  ;;  %p1025_p0 = scmp.lt.s32.totalorder %s1016_s28, %s1016_s28 }
  0x35   : > { %p1019_p7 = pnand %p1017_p5, %p977_p13  ;;  %p1026_p1 = por %p1025_p0, %p1024_p12 }
  0x37   : > { %p1020_p9 = pneg %p1019_p7 }
  0x39   : > { %p1027_p2 = pnand %p1026_p1, %p1020_p9 }
  0x3b   : > { %1030 = shalt.err (!%p1027_p2)
}
  0x3c   : > { %922 = dma.hbm_to_vmem [thread:$0]  (!%p1222_p11), %s1480_s3, 8192, %s1226_s6, [#allocation6], %s1135_s15, %s1135_s15, %s1136_s16  }
  0x3d   : > { %s1287_s29 = sadd.s32 1, %s1131_s21   ;;  %s29_s14 = sadd.s32 1, %s1127_s20 }
  0x3e   : > { %s26_s17 = ssub.s32 %s1131_s21, %s1287_s29  ;;  %p36_p13 = scmp.ne.s32.totalorder %s1127_s20, %s1123_s19 }
  0x3f   : > { %p27_p6 = scmp.eq.s32.totalorder %s26_s17, 0  ;;  %p37_p10 = scmp.eq.s32.totalorder %s1131_s21, 0 }
  0x40   : > { %p1490_p3 = scmp.eq.s32.totalorder %s1192_s22, 1  ;;  %p933_p7 = scmp.lt.s32.totalorder %s1131_s21, 2 }
  0x41   : > { %s1303_s27 = scalar_select %p27_p6, %s1127_s20, %s29_s14  }
  0x42   : > { %p1297_p5 = por %p1490_p3, %p36_p13  ;;  %p38_p9 = por %p37_p10, %p36_p13 }
  0x43   : > { %s208_s30 = sand.u32 1, %s1127_s20   ;;  %s773_s6 = sshll.u32 %s1131_s21, 10 }
  0x44   : > { %s1491_s23 = scalar_select %p1297_p5, 1, 0 }
  0x45   : > { %s757_s7 = sshll.u32 %s208_s30, 6  ;;  %s1310_s10 = scalar_lea.hbm %s1477_s0, %s773_s6 }
  0x46   : > { %s212_s11 = scalar_lea.vmem [#allocation2], %s757_s7  ;;  %p1314_p11 = pnand %p933_p7, %p38_p9 }
  0x47   : > { %s220_s28 = sshll.u32 %s212_s11, 4  ;;  %s1318_s13 = scalar_lea.sflag [#allocation3], %s208_s30  ;;  %s1312_s28 = int_to_ptr.vmem [resolvable:$true] %s220_s28 }
  0x48   : > { %s1031_s14 = scalar_lea.hbm %s1310_s10, 1024  ;;  %p1033_p0 = pneg %p1314_p11 }
  0x49   : > { %p1032_p12 = scmp.ne.s32.totalorder %s1310_s10, %s1031_s14  ;;  %s1036_s6 = scalar_lea.hbm %s1477_s0, 2048 }
  0x4a   : > { %p1037_p13 = scmp.lt.u32.totalorder %s1310_s10, %s1477_s0  ;;  %p1038_p6 = scmp.lt.u32.totalorder %s1036_s6, %s1031_s14 }
  0x4b   : > { %p1034_p1 = pnand %p1033_p0, %p1032_p12  ;;  %p1040_p3 = scmp.lt.u32.totalorder %s1031_s14, %s1310_s10 }
  0x4c   : > { %p1039_p10 = por %p1038_p6, %p1037_p13 }
  0x4d   : > { %p1035_p2 = pneg %p1034_p1 }
  0x4e   : > { %p1041_p7 = por %p1040_p3, %p1039_p10 }
  0x50   : > { %p1042_p9 = pnand %p1041_p7, %p1035_p2 }
  0x52   : > { %1045 = shalt.err (!%p1042_p9)
}
  0x53   : > { %s1046_s30 = scalar_lea.vmem %s1312_s28, 1024  ;;  %s1137_s11 = smov [#allocation2]  }
  0x54   : > { %p1047_p12 = scmp.ne.s32.totalorder %s1312_s28, %s1046_s30  ;;  %s1051_s17 = sshll.u32 %s1137_s11, 4  ;;  %s1052_s17 = int_to_ptr.vmem [resolvable:$false] %s1051_s17 }
  0x55   : > { %s1053_s7 = scalar_lea.vmem %s1052_s17, 2048  ;;  %p1054_p4 = scmp.lt.s32.totalorder %s1312_s28, %s1052_s17 }
  0x56   : > { %p1049_p1 = pnand %p1047_p12, %p1033_p0  ;;  %p1055_p13 = scmp.lt.s32.totalorder %s1053_s7, %s1046_s30 }
  0x58   : > { %p1050_p5 = pneg %p1049_p1  ;;  %p1056_p6 = por %p1055_p13, %p1054_p4 }
  0x5a   : > { %p1057_p10 = pnand %p1056_p6, %p1050_p5 }
  0x5c   : > { %1060 = shalt.err (!%p1057_p10)
}
  0x5d   : > { %926 = dma.hbm_to_vmem [thread:$0]  (!%p1314_p11), %s1310_s10, 1024, %s1312_s28, %s1318_s13, %s1135_s15, %s1135_s15, %s1136_s16  }
  0x5e   : > { %232 = sbr.rel (%p1211_p8) target bundleno = 636 (0x27c), region = 40  ;;  %s1352_s14 = sand.u32 (!%p1211_p8), 1, %s1123_s19  }
  0x5f   : > { %s762_s6 = sshll.u32 (!%p1211_p8), %s1352_s14, 6  ;;  %s235_s8 = scalar_lea.sflag (!%p1211_p8), [#allocation3], %s1352_s14 }
  0x60   : > { %s1358_s12 = scalar_lea.vmem (!%p1211_p8), [#allocation2], %s762_s6  ;;  %p1493_p4 = scmp.ne.s32.totalorder (!%p1211_p8), %s1486_s24, 0 }
  0x65   : > { %1106 = dma.done.wait (%p1493_p4), %s235_s8, 1024  }
  0x66   : > { %1108 = vsyncadd (%p1493_p4), %s235_s8, 4294966272  ;;  %p1494_p5 = scmp.eq.s32.totalorder %s1192_s22, 0 }
  0x68   : > { %1110 = dma.done.wait (%p1494_p5), [#allocation6], 16384   ;;  %p1495_p8 = pmov %p1494_p5 }
  0x69   : > { %v284_v0 = vld [vmem:[#allocation5 + $0x8] sm:$0xff]  ;;  %v286_v1 = vld [vmem:[#allocation5 + $0x18] sm:$0xff]  ;;  %v283_v2 = vld [vmem:[#allocation5] sm:$0xff]  ;;  %s1410_s10 = scalar_lea.vmem [#allocation8], %s762_s6  ;;  %s775_s13 = sshll.u32 %s1192_s22, 10 }
  0x6a   : > { %1112 = vsyncadd (%p1495_p8), [#allocation6], 4294950912  ;;  %v776_v3 = vpack.c.bf16 %v286_v1, %v284_v0  ;;  %v285_v4 = vld [vmem:[#allocation5 + $0x10] sm:$0xff]  ;;  %v288_v5 = vld [vmem:[#allocation5 + $0x28] sm:$0xff]  ;;  %s660_s28 = sshll.u32 %s1410_s10, 4  ;;  %s1431_s11 = scalar_lea.hbm %s1482_s5, %s775_s13  ;;  %s1424_s28 = int_to_ptr.vmem [resolvable:$true] %s660_s28 }
  0x6b   : > { %v290_v6 = vld [vmem:[#allocation5 + $0x38] sm:$0xff]  ;;  %v778_v7 = vpack.c.bf16 %v285_v4, %v283_v2  ;;  %v287_v9 = vld [vmem:[#allocation5 + $0x20] sm:$0xff]  ;;  %v289_v10 = vld [vmem:[#allocation5 + $0x30] sm:$0xff]  ;;  %s646_s22 = scalar_lea.sflag [#allocation4], %s1352_s14  ;;  %s1061_s17 = scalar_lea.vmem %s1424_s28, 1024 }
  0x6c   : > { %v780_v8 = vpack.c.bf16 %v290_v6, %v288_v5  ;;  %v292_v11 = vld [vmem:[#allocation5 + $0x48] sm:$0xff]  ;;  %777 = vmatprep.subr.bf16.mxu0 %v776_v3  ;;  %v294_v12 = vld [vmem:[#allocation5 + $0x58] sm:$0xff]  ;;  %v782_v13 = vpack.c.bf16 %v289_v10, %v287_v9  ;;  %v291_v15 = vld [vmem:[#allocation5 + $0x40] sm:$0xff]  ;;  %p1062_p11 = scmp.ne.s32.totalorder %s1424_s28, %s1061_s17  ;;  %p1496_p0 = scmp.ne.s32.totalorder %s1491_s23, 0 }
  0x6d   : > { %779 = vmatpush1.bf16.msra.mxu0 %v778_v7  ;;  %v784_v14 = vpack.c.bf16 %v294_v12, %v292_v11  ;;  %v293_v16 = vld [vmem:[#allocation5 + $0x50] sm:$0xff]  ;;  %v296_v17 = vld [vmem:[#allocation5 + $0x68] sm:$0xff]  ;;  %v298_v18 = vld [vmem:[#allocation5 + $0x78] sm:$0xff]  ;;  %s1138_s7 = smov [#allocation8]  }
  0x6e   : > { %781 = vmatprep.subr.bf16.mxu0 %v780_v8  ;;  %v786_v19 = vpack.c.bf16 %v293_v16, %v291_v15  ;;  %v788_v20 = vpack.c.bf16 %v298_v18, %v296_v17  ;;  %v295_v21 = vld [vmem:[#allocation5 + $0x60] sm:$0xff]  ;;  %v297_v22 = vld [vmem:[#allocation5 + $0x70] sm:$0xff]  ;;  %v300_v23 = vld [vmem:[#allocation5 + $0x88] sm:$0xff]  ;;  %p1063_p2 = pnand %p1062_p11, %p1496_p0  ;;  %s1065_s6 = sshll.u32 %s1138_s7, 4  ;;  %s1066_s6 = int_to_ptr.vmem [resolvable:$false] %s1065_s6 }
  0x6f   : > { %v302_v24 = vld [vmem:[#allocation5 + $0x98] sm:$0xff]  ;;  %v790_v25 = vpack.c.bf16 %v297_v22, %v295_v21  ;;  %v299_v27 = vld [vmem:[#allocation5 + $0x80] sm:$0xff]  ;;  %v301_v28 = vld [vmem:[#allocation5 + $0x90] sm:$0xff]  ;;  %s1067_s8 = scalar_lea.vmem %s1066_s6, 2048  ;;  %p1068_p7 = scmp.lt.s32.totalorder %s1424_s28, %s1066_s6 }
  0x70   : > { %v792_v26 = vpack.c.bf16 %v302_v24, %v300_v23  ;;  %v304_v29 = vld [vmem:[#allocation5 + $0xa8] sm:$0xff]  ;;  %v306_v30 = vld [vmem:[#allocation5 + $0xb8] sm:$0xff]  ;;  %v794_v31 = vpack.c.bf16 %v301_v28, %v299_v27  ;;  %v303_v33 = vld [vmem:[#allocation5 + $0xa0] sm:$0xff]  ;;  %p1064_p3 = pneg %p1063_p2  ;;  %p1069_p9 = scmp.lt.s32.totalorder %s1067_s8, %s1061_s17 }
  0x71   : > { %783 = vmatpush1.bf16.msra.mxu0 %v782_v13  ;;  %v796_v32 = vpack.c.bf16 %v306_v30, %v304_v29  ;;  %v305_v34 = vld [vmem:[#allocation5 + $0xb0] sm:$0xff]  ;;  %v308_v35 = vld [vmem:[#allocation5 + $0xc8] sm:$0xff]  ;;  %v310_v36 = vld [vmem:[#allocation5 + $0xd8] sm:$0xff] }
  0x72   : > { %785 = vmatprep.subr.bf16.mxu0 %v784_v14  ;;  %v798_v37 = vpack.c.bf16 %v305_v34, %v303_v33  ;;  %v800_v38 = vpack.c.bf16 %v310_v36, %v308_v35  ;;  %v307_v39 = vld [vmem:[#allocation5 + $0xc0] sm:$0xff]  ;;  %v309_v40 = vld [vmem:[#allocation5 + $0xd0] sm:$0xff]  ;;  %v1369_v41 = vld [vmem:[%s1358_s12 + $0x8] sm:$0xff]  ;;  %p1070_p12 = por %p1069_p9, %p1068_p7 }
  0x73   : > { %v312_v42 = vld [vmem:[#allocation5 + $0xe8] sm:$0xff]  ;;  %v314_v43 = vld [vmem:[#allocation5 + $0xf8] sm:$0xff]  ;;  %423 = vmatprep.mubr.f32.mxu0 %v1369_v41  ;;  %v311_v44 = vld [vmem:[#allocation5 + $0xe0] sm:$0xff]  ;;  %v802_v46 = vpack.c.bf16 %v309_v40, %v307_v39 }
  0x74   : > { %v313_v45 = vld [vmem:[#allocation5 + $0xf0] sm:$0xff]  ;;  %v316_v47 = vld [vmem:[#allocation5 + $0x108] sm:$0xff]  ;;  %v318_v48 = vld [vmem:[#allocation5 + $0x118] sm:$0xff]  ;;  %v804_v52 = vpack.c.bf16 %v314_v43, %v312_v42  ;;  %p1071_p1 = pnand %p1070_p12, %p1064_p3 }
  0x75   : > { %787 = vmatpush1.bf16.msra.mxu0 %v786_v19  ;;  %v457_v49 = vld [vmem:[#allocation7 + $0x8] sm:$0xff]  ;;  %v459_v50 = vld [vmem:[#allocation7 + $0x18] sm:$0xff]  ;;  %v456_v51 = vld [vmem:[#allocation7] sm:$0xff]  ;;  %v806_v63 = vpack.c.bf16 %v313_v45, %v311_v44  ;;  %v808_v3 = vpack.c.bf16 %v318_v48, %v316_v47 }
  0x76   : > { %789 = vmatprep.subr.bf16.mxu0 %v788_v20  ;;  %v840_v53 = vpack.c.bf16 %v459_v50, %v457_v49  ;;  %v458_v54 = vld [vmem:[#allocation7 + $0x10] sm:$0xff]  ;;  %v461_v55 = vld [vmem:[#allocation7 + $0x28] sm:$0xff]  ;;  %v463_v56 = vld [vmem:[#allocation7 + $0x38] sm:$0xff] }
  0x77   : > { %v842_v57 = vpack.c.bf16 %v458_v54, %v456_v51  ;;  %v844_v58 = vpack.c.bf16 %v463_v56, %v461_v55  ;;  %v460_v59 = vld [vmem:[#allocation7 + $0x20] sm:$0xff]  ;;  %v462_v60 = vld [vmem:[#allocation7 + $0x30] sm:$0xff]  ;;  %v465_v61 = vld [vmem:[#allocation7 + $0x48] sm:$0xff] }
  0x78   : > { %841 = vmatprep.subr.bf16.mxu1 %v840_v53  ;;  %v467_v62 = vld [vmem:[#allocation7 + $0x58] sm:$0xff]  ;;  %v315_v0 = vld [vmem:[#allocation5 + $0x100] sm:$0xff]  ;;  %v317_v1 = vld [vmem:[#allocation5 + $0x110] sm:$0xff]  ;;  %v846_v2 = vpack.c.bf16 %v462_v60, %v460_v59 }
  0x79   : > { %791 = vmatpush1.bf16.msra.mxu0 %v790_v25  ;;  %843 = vmatpush1.bf16.msra.mxu1 %v842_v57  ;;  %v320_v4 = vld [vmem:[#allocation5 + $0x128] sm:$0xff]  ;;  %v848_v5 = vpack.c.bf16 %v467_v62, %v465_v61  ;;  %v464_v6 = vld [vmem:[#allocation7 + $0x40] sm:$0xff]  ;;  %v466_v7 = vld [vmem:[#allocation7 + $0x50] sm:$0xff]  ;;  %v810_v11 = vpack.c.bf16 %v317_v1, %v315_v0 }
  0x7a   : > { %793 = vmatprep.subr.bf16.mxu0 %v792_v26  ;;  %845 = vmatprep.subr.bf16.mxu1 %v844_v58  ;;  %v322_v8 = vld [vmem:[#allocation5 + $0x138] sm:$0xff]  ;;  %v469_v9 = vld [vmem:[#allocation7 + $0x68] sm:$0xff]  ;;  %v319_v12 = vld [vmem:[#allocation5 + $0x120] sm:$0xff]  ;;  %v850_v14 = vpack.c.bf16 %v466_v7, %v464_v6 }
  0x7b   : > { %v471_v10 = vld [vmem:[#allocation7 + $0x78] sm:$0xff]  ;;  %v321_v13 = vld [vmem:[#allocation5 + $0x130] sm:$0xff]  ;;  %v812_v15 = vpack.c.bf16 %v322_v8, %v320_v4  ;;  %v324_v16 = vld [vmem:[#allocation5 + $0x148] sm:$0xff] }
  0x7c   : > { %v852_v17 = vpack.c.bf16 %v471_v10, %v469_v9  ;;  %v468_v18 = vld [vmem:[#allocation7 + $0x60] sm:$0xff]  ;;  %v470_v19 = vld [vmem:[#allocation7 + $0x70] sm:$0xff]  ;;  %v326_v20 = vld [vmem:[#allocation5 + $0x158] sm:$0xff]  ;;  %v814_v23 = vpack.c.bf16 %v321_v13, %v319_v12 }
  0x7d   : > { %795 = vmatpush1.bf16.msra.mxu0 %v794_v31  ;;  %847 = vmatpush1.bf16.msra.mxu1 %v846_v2  ;;  %v473_v21 = vld [vmem:[#allocation7 + $0x88] sm:$0xff]  ;;  %v475_v22 = vld [vmem:[#allocation7 + $0x98] sm:$0xff]  ;;  %v323_v24 = vld [vmem:[#allocation5 + $0x140] sm:$0xff]  ;;  %v854_v26 = vpack.c.bf16 %v470_v19, %v468_v18  ;;  %v816_v27 = vpack.c.bf16 %v326_v20, %v324_v16 }
  0x7e   : > { %797 = vmatprep.subr.bf16.mxu0 %v796_v32  ;;  %849 = vmatprep.subr.bf16.mxu1 %v848_v5  ;;  %v325_v25 = vld [vmem:[#allocation5 + $0x150] sm:$0xff]  ;;  %v328_v28 = vld [vmem:[#allocation5 + $0x168] sm:$0xff]  ;;  %v856_v29 = vpack.c.bf16 %v475_v22, %v473_v21  ;;  %v472_v30 = vld [vmem:[#allocation7 + $0x80] sm:$0xff] }
  0x7f   : > { %v474_v31 = vld [vmem:[#allocation7 + $0x90] sm:$0xff]  ;;  %v330_v32 = vld [vmem:[#allocation5 + $0x178] sm:$0xff]  ;;  %v477_v33 = vld [vmem:[#allocation7 + $0xa8] sm:$0xff]  ;;  %v818_v35 = vpack.c.bf16 %v325_v25, %v323_v24 }
  0x80   : > { %v479_v34 = vld [vmem:[#allocation7 + $0xb8] sm:$0xff]  ;;  %v327_v36 = vld [vmem:[#allocation5 + $0x160] sm:$0xff]  ;;  %v820_v39 = vpack.c.bf16 %v330_v32, %v328_v28  ;;  %v332_v40 = vld [vmem:[#allocation5 + $0x188] sm:$0xff] }
  0x81   : > { %799 = vmatpush1.bf16.msra.mxu0 %v798_v37  ;;  %851 = vmatpush1.bf16.msra.mxu1 %v850_v14  ;;  %v329_v37 = vld [vmem:[#allocation5 + $0x170] sm:$0xff]  ;;  %v860_v42 = vpack.c.bf16 %v479_v34, %v477_v33  ;;  %v476_v43 = vld [vmem:[#allocation7 + $0xa0] sm:$0xff]  ;;  %v334_v45 = vld [vmem:[#allocation5 + $0x198] sm:$0xff] }
  0x82   : > { %801 = vmatprep.subr.bf16.mxu0 %v800_v38  ;;  %853 = vmatprep.subr.bf16.mxu1 %v852_v17  ;;  %v858_v38 = vpack.c.bf16 %v474_v31, %v472_v30  ;;  %v478_v44 = vld [vmem:[#allocation7 + $0xb0] sm:$0xff]  ;;  %v483_v47 = vld [vmem:[#allocation7 + $0xd8] sm:$0xff]  ;;  %v822_v48 = vpack.c.bf16 %v329_v37, %v327_v36  ;;  %v331_v49 = vld [vmem:[#allocation5 + $0x180] sm:$0xff] }
  0x83   : > { %v333_v50 = vld [vmem:[#allocation5 + $0x190] sm:$0xff]  ;;  %v862_v51 = vpack.c.bf16 %v478_v44, %v476_v43  ;;  %v336_v53 = vld [vmem:[#allocation5 + $0x1a8] sm:$0xff]  ;;  %v480_v55 = vld [vmem:[#allocation7 + $0xc0] sm:$0xff] }
  0x84   : > { %v482_v56 = vld [vmem:[#allocation7 + $0xd0] sm:$0xff]  ;;  %v338_v57 = vld [vmem:[#allocation5 + $0x1b8] sm:$0xff]  ;;  %v485_v58 = vld [vmem:[#allocation7 + $0xe8] sm:$0xff]  ;;  %v826_v60 = vpack.c.bf16 %v333_v50, %v331_v49 }
  0x85   : > { %803 = vmatpush1.bf16.msra.mxu0 %v802_v46  ;;  %855 = vmatpush1.bf16.msra.mxu1 %v854_v26  ;;  %v481_v46 = vld [vmem:[#allocation7 + $0xc8] sm:$0xff]  ;;  %v487_v59 = vld [vmem:[#allocation7 + $0xf8] sm:$0xff]  ;;  %v335_v61 = vld [vmem:[#allocation5 + $0x1a0] sm:$0xff]  ;;  %v828_v0 = vpack.c.bf16 %v338_v57, %v336_v53 }
  0x86   : > { %805 = vmatprep.subr.bf16.mxu0 %v804_v52  ;;  %857 = vmatprep.subr.bf16.mxu1 %v856_v29  ;;  %v824_v52 = vpack.c.bf16 %v334_v45, %v332_v40  ;;  %v864_v54 = vpack.c.bf16 %v483_v47, %v481_v46  ;;  %v337_v62 = vld [vmem:[#allocation5 + $0x1b0] sm:$0xff]  ;;  %v340_v1 = vld [vmem:[#allocation5 + $0x1c8] sm:$0xff]  ;;  %v868_v2 = vpack.c.bf16 %v487_v59, %v485_v58  ;;  %v342_v5 = vld [vmem:[#allocation5 + $0x1d8] sm:$0xff] }
  0x87   : > { %v486_v4 = vld [vmem:[#allocation7 + $0xf0] sm:$0xff]  ;;  %v489_v6 = vld [vmem:[#allocation7 + $0x108] sm:$0xff]  ;;  %v491_v7 = vld [vmem:[#allocation7 + $0x118] sm:$0xff]  ;;  %v830_v8 = vpack.c.bf16 %v337_v62, %v335_v61  ;;  %v832_v12 = vpack.c.bf16 %v342_v5, %v340_v1 }
  0x88   : > { %v339_v9 = vld [vmem:[#allocation5 + $0x1c0] sm:$0xff]  ;;  %v341_v10 = vld [vmem:[#allocation5 + $0x1d0] sm:$0xff]  ;;  %v344_v13 = vld [vmem:[#allocation5 + $0x1e8] sm:$0xff]  ;;  %v872_v14 = vpack.c.bf16 %v491_v7, %v489_v6 }
  0x89   : > { %807 = vmatpush1.bf16.msra.mxu0 %v806_v63  ;;  %859 = vmatpush1.bf16.msra.mxu1 %v858_v38  ;;  %v866_v63 = vpack.c.bf16 %v482_v56, %v480_v55  ;;  %v490_v16 = vld [vmem:[#allocation7 + $0x110] sm:$0xff]  ;;  %v346_v17 = vld [vmem:[#allocation5 + $0x1f8] sm:$0xff]  ;;  %v493_v18 = vld [vmem:[#allocation7 + $0x128] sm:$0xff]  ;;  %v834_v20 = vpack.c.bf16 %v341_v10, %v339_v9  ;;  %v349_v10 = vlaneseq }
  0x8a   : > { %809 = vmatprep.subr.bf16.mxu0 %v808_v3  ;;  %861 = vmatprep.subr.bf16.mxu1 %v860_v42  ;;  %v484_v3 = vld [vmem:[#allocation7 + $0xe0] sm:$0xff]  ;;  %v495_v19 = vld [vmem:[#allocation7 + $0x138] sm:$0xff]  ;;  %v345_v24 = vld [vmem:[#allocation5 + $0x1f0] sm:$0xff] }
  0x8b   : > { %v343_v21 = vld [vmem:[#allocation5 + $0x1e0] sm:$0xff]  ;;  %v876_v25 = vpack.c.bf16 %v495_v19, %v493_v18  ;;  %v497_v28 = vld [vmem:[#allocation7 + $0x148] sm:$0xff]  ;;  %v499_v29 = vld [vmem:[#allocation7 + $0x158] sm:$0xff] }
  0x8c   : > { %v492_v26 = vld [vmem:[#allocation7 + $0x120] sm:$0xff]  ;;  %v838_v30 = vpack.c.bf16 %v345_v24, %v343_v21  ;;  %v880_v32 = vpack.c.bf16 %v499_v29, %v497_v28  ;;  %v498_v34 = vld [vmem:[#allocation7 + $0x150] sm:$0xff]  ;;  %v503_v36 = vld [vmem:[#allocation7 + $0x178] sm:$0xff] }
  0x8d   : > { %811 = vmatpush1.bf16.msra.mxu0 %v810_v11  ;;  %863 = vmatpush1.bf16.msra.mxu1 %v862_v51  ;;  %v870_v11 = vpack.c.bf16 %v486_v4, %v484_v3  ;;  %v496_v33 = vld [vmem:[#allocation7 + $0x140] sm:$0xff]  ;;  %v502_v43 = vld [vmem:[#allocation7 + $0x170] sm:$0xff]  ;;  %v505_v44 = vld [vmem:[#allocation7 + $0x188] sm:$0xff] }
  0x8e   : > { %813 = vmatprep.subr.bf16.mxu0 %v812_v15  ;;  %865 = vmatprep.subr.bf16.mxu1 %v864_v54  ;;  %v488_v15 = vld [vmem:[#allocation7 + $0x100] sm:$0xff]  ;;  %v882_v38 = vpack.c.bf16 %v498_v34, %v496_v33  ;;  %v507_v45 = vld [vmem:[#allocation7 + $0x198] sm:$0xff]  ;;  %v1381_v46 = vld [vmem:[%s1358_s12 + $0x10] sm:$0xff] }
  0x8f   : > { %v874_v22 = vpack.c.bf16 %v490_v16, %v488_v15  ;;  %v1373_v37 = vld [vmem:[%s1358_s12] sm:$0xff]  ;;  %v888_v49 = vpack.c.bf16 %v507_v45, %v505_v44  ;;  %v506_v51 = vld [vmem:[#allocation7 + $0x190] sm:$0xff]  ;;  %v511_v53 = vld [vmem:[#allocation7 + $0x1b8] sm:$0xff] }
  0x90   : > { %v500_v42 = vld [vmem:[#allocation7 + $0x160] sm:$0xff]  ;;  %v1392_v56 = vld [vmem:[%s1358_s12 + $0x38] sm:$0xff]  ;;  %v510_v59 = vld [vmem:[#allocation7 + $0x1b0] sm:$0xff] }
  0x91   : > { %815 = vmatpush1.bf16.msra.mxu0 %v814_v23  ;;  %867 = vmatpush1.bf16.msra.mxu1 %v866_v63  ;;  %v836_v23 = vpack.c.bf16 %v346_v17, %v344_v13  ;;  %v886_v47 = vpack.c.bf16 %v502_v43, %v500_v42  ;;  %v504_v50 = vld [vmem:[#allocation7 + $0x180] sm:$0xff]  ;;  %v515_v61 = vld [vmem:[#allocation7 + $0x1d8] sm:$0xff]  ;;  %v1397_v62 = vld [vmem:[%s1358_s12 + $0x30] sm:$0xff] }
  0x92   : > { %817 = vmatprep.subr.bf16.mxu0 %v816_v27  ;;  %869 = vmatprep.subr.bf16.mxu1 %v868_v2  ;;  %v494_v27 = vld [vmem:[#allocation7 + $0x130] sm:$0xff]  ;;  %v1389_v54 = vld [vmem:[%s1358_s12 + $0x20] sm:$0xff]  ;;  %v890_v55 = vpack.c.bf16 %v506_v51, %v504_v50  ;;  %v517_v4 = vld [vmem:[#allocation7 + $0x1e8] sm:$0xff] }
  0x93   : > { %v878_v31 = vpack.c.bf16 %v494_v27, %v492_v26  ;;  %v508_v58 = vld [vmem:[#allocation7 + $0x1a0] sm:$0xff]  ;;  %v514_v2 = vld [vmem:[#allocation7 + $0x1d0] sm:$0xff]  ;;  %v519_v5 = vld [vmem:[#allocation7 + $0x1f8] sm:$0xff] }
  0x94   : > { %v894_v63 = vpack.c.bf16 %v510_v59, %v508_v58  ;;  %v512_v1 = vld [vmem:[#allocation7 + $0x1c0] sm:$0xff]  ;;  %v900_v6 = vpack.c.bf16 %v519_v5, %v517_v4 }
  0x95   : > { %819 = vmatpush1.bf16.msra.mxu0 %v818_v35  ;;  %871 = vmatpush1.bf16.msra.mxu1 %v870_v11  ;;  %v501_v35 = vld [vmem:[#allocation7 + $0x168] sm:$0xff]  ;;  %v898_v3 = vpack.c.bf16 %v514_v2, %v512_v1  ;;  %v516_v7 = vld [vmem:[#allocation7 + $0x1e0] sm:$0xff]  ;;  %v350_v11 = vshrl.u32 %v349_v10, 7 }
  0x96   : > { %821 = vmatprep.subr.bf16.mxu0 %v820_v39  ;;  %873 = vmatprep.subr.bf16.mxu1 %v872_v14  ;;  %v1376_v39 = vld [vmem:[%s1358_s12 + $0x18] sm:$0xff]  ;;  %v884_v40 = vpack.c.bf16 %v503_v36, %v501_v35  ;;  %v347_v13 = vld [vmem:[%s1479_s2] sm:$0x3] }
  0x97   : > { %v355_v14 = vsub.s32 1, %v350_v11  ;;  %v520_v44 = vld [vmem:[%s1481_s4] sm:$0x3] }
  0x99   : > { %823 = vmatpush1.bf16.msra.mxu0 %v822_v48  ;;  %875 = vmatpush1.bf16.msra.mxu1 %v874_v22  ;;  %v1384_v48 = vld [vmem:[%s1358_s12 + $0x28] sm:$0xff]  ;;  %v356_v16 = vrot.slane %v347_v13, %v355_v14 }
  0x9a   : > { %825 = vmatprep.subr.bf16.mxu0 %v824_v52  ;;  %877 = vmatprep.subr.bf16.mxu1 %v876_v25  ;;  %v509_v52 = vld [vmem:[#allocation7 + $0x1a8] sm:$0xff] }
  0x9b   : > { %v892_v57 = vpack.c.bf16 %v511_v53, %v509_v52 }
  0x9d   : > { %827 = vmatpush1.bf16.msra.mxu0 %v826_v60  ;;  %879 = vmatpush1.bf16.msra.mxu1 %v878_v31  ;;  %v513_v60 = vld [vmem:[#allocation7 + $0x1c8] sm:$0xff] }
  0x9e   : > { %829 = vmatprep.subr.bf16.mxu0 %v828_v0  ;;  %881 = vmatprep.subr.bf16.mxu1 %v880_v32  ;;  %v896_v0 = vpack.c.bf16 %v515_v61, %v513_v60 }
  0xa1   : > { %831 = vmatpush1.bf16.msra.mxu0 %v830_v8  ;;  %883 = vmatpush1.bf16.msra.mxu1 %v882_v38  ;;  %v518_v8 = vld [vmem:[#allocation7 + $0x1f0] sm:$0xff] }
  0xa2   : > { %833 = vmatprep.subr.bf16.mxu0 %v832_v12  ;;  %885 = vmatprep.subr.bf16.mxu1 %v884_v40  ;;  %v902_v9 = vpack.c.bf16 %v518_v8, %v516_v7  ;;  %v351_v12 = vsub.s32 0, %v350_v11 }
  0xa4   : > { %v352_v15 = vrot.slane %v347_v13, %v351_v12  ;;  %v525_v45 = vrot.slane %v520_v44, %v351_v12 }
  0xa5   : > { %835 = vmatpush1.bf16.msra.mxu0 %v834_v20  ;;  %887 = vmatpush1.bf16.msra.mxu1 %v886_v47  ;;  %v529_v47 = vrot.slane %v520_v44, %v355_v14 }
  0xa6   : > { %837 = vmatprep.subr.bf16.mxu0 %v836_v23  ;;  %889 = vmatprep.subr.bf16.mxu1 %v888_v49 }
  0xa9   : > { %839 = vmatpush1.bf16.msra.mxu0 %v838_v30  ;;  %891 = vmatpush1.bf16.msra.mxu1 %v890_v55 }
  0xaa   : > { %893 = vmatprep.subr.bf16.mxu1 %v892_v57 }
  0xac   : > { %424 = vmatmul.mubr.f32.vlgmr.msra.gmra.mrb[0].mxu0 %v1373_v37 }
  0xad   : > { %429 = vmatprep.mubr.f32.mxu0 %v1376_v39  ;;  %895 = vmatpush1.bf16.msra.mxu1 %v894_v63 }
  0xae   : > { %897 = vmatprep.subr.bf16.mxu1 %v896_v0 }
  0xb0   : > { %430 = vmatmul.mubr.f32.gmra.mrb[2].mxu0 %v1381_v46 }
  0xb1   : > { %435 = vmatprep.mubr.f32.mxu0 %v1384_v48  ;;  %899 = vmatpush1.bf16.msra.mxu1 %v898_v3 }
  0xb2   : > { %901 = vmatprep.subr.bf16.mxu1 %v900_v6 }
  0xb4   : > { %436 = vmatmul.mubr.f32.gmra.mrb[4].mxu0 %v1389_v54 }
  0xb5   : > { %441 = vmatprep.mubr.f32.mxu0 %v1392_v56  ;;  %903 = vmatpush1.bf16.msra.mxu1 %v902_v9 }
  0xb8   : > { %442 = vmatmul.mubr.f32.gmra.mrb[6].mxu0 %v1397_v62 }
 0x17f   : > { %v425_v17 = vpop.f32.mrb[0].mxu0 }
 0x180   : > { %v426_v18 = vadd.f32 %v425_v17, %v352_v15  ;;  %v427_v19 = vpop.f32.mrb[1].mxu0 }
 0x181   : > { %v428_v20 = vadd.f32 %v427_v19, %v356_v16 }
 0x182   : > { %v448_v23 = vmax.f32 %v426_v18, 0.0 }
 0x183   : > { %v431_v21 = vpop.f32.mrb[2].mxu0  ;;  %v449_v22 = vmax.f32 %v428_v20, 0.0 }
 0x184   : > { %v432_v24 = vadd.f32 %v431_v21, %v352_v15  ;;  %v433_v25 = vpop.f32.mrb[3].mxu0 }
 0x185   : > { %v434_v26 = vadd.f32 %v433_v25, %v356_v16  ;;  %596 = vmatprep.mubr.f32.mxu1 %v449_v22 }
 0x186   : > { %597 = vmatmul.mubr.f32.vlgmr.msra.gmra.mrb[0].mxu1 %v448_v23  ;;  %v450_v29 = vmax.f32 %v432_v24, 0.0 }
 0x187   : > { %v451_v27 = vmax.f32 %v434_v26, 0.0  ;;  %v437_v28 = vpop.f32.mrb[4].mxu0 }
 0x188   : > { %v438_v30 = vadd.f32 %v437_v28, %v352_v15  ;;  %v439_v31 = vpop.f32.mrb[5].mxu0 }
 0x189   : > { %v440_v32 = vadd.f32 %v439_v31, %v356_v16  ;;  %602 = vmatprep.mubr.f32.mxu1 %v451_v27 }
 0x18a   : > { %603 = vmatmul.mubr.f32.gmra.mrb[2].mxu1 %v450_v29  ;;  %v452_v35 = vmax.f32 %v438_v30, 0.0 }
 0x18b   : > { %v453_v33 = vmax.f32 %v440_v32, 0.0  ;;  %v443_v34 = vpop.f32.mrb[6].mxu0 }
 0x18c   : > { %v444_v36 = vadd.f32 %v443_v34, %v352_v15  ;;  %v445_v38 = vpop.f32.mrb[7].mxu0 }
 0x18d   : > { %v446_v40 = vadd.f32 %v445_v38, %v356_v16  ;;  %608 = vmatprep.mubr.f32.mxu1 %v453_v33 }
 0x18e   : > { %609 = vmatmul.mubr.f32.gmra.mrb[4].mxu1 %v452_v35  ;;  %v454_v43 = vmax.f32 %v444_v36, 0.0 }
 0x18f   : > { %v455_v42 = vmax.f32 %v446_v40, 0.0 }
 0x191   : > { %614 = vmatprep.mubr.f32.mxu1 %v455_v42 }
 0x192   : > { %615 = vmatmul.mubr.f32.gmra.mrb[6].mxu1 %v454_v43 }
 0x259   : > { %v598_v49 = vpop.f32.mrb[0].mxu1 }
 0x25a   : > { %v599_v50 = vadd.f32 %v598_v49, %v525_v45  ;;  %v600_v51 = vpop.f32.mrb[1].mxu1 }
 0x25b   : > { %v601_v52 = vadd.f32 %v600_v51, %v529_v47 }
 0x25c   : > { %v621_v53 = vadd.f32 %v599_v50, %v1373_v37 }
 0x25d   : > { %v622_v55 = vadd.f32 %v601_v52, %v1369_v41  ;;  %v604_v57 = vpop.f32.mrb[2].mxu1 }
 0x25e   : > { %v629_v58 = vmax.f32 %v621_v53, 0.0  ;;  %v605_v59 = vadd.f32 %v604_v57, %v525_v45  ;;  %v606_v60 = vpop.f32.mrb[3].mxu1 }
 0x25f   : > { %v630_v61 = vmax.f32 %v622_v55, 0.0  ;;  %v607_v63 = vadd.f32 %v606_v60, %v529_v47 }
 0x260   : > { %637 = vst [vmem:[%s1410_s10] sm:$0xff] %v629_v58  ;;  %v623_v0 = vadd.f32 %v605_v59, %v1381_v46 }
 0x261   : > { %638 = vst [vmem:[%s1410_s10 + $0x8] sm:$0xff] %v630_v61  ;;  %v624_v41 = vadd.f32 %v607_v63, %v1376_v39  ;;  %v610_v37 = vpop.f32.mrb[4].mxu1 }
 0x262   : > { %v631_v1 = vmax.f32 %v623_v0, 0.0  ;;  %v611_v2 = vadd.f32 %v610_v37, %v525_v45  ;;  %v612_v3 = vpop.f32.mrb[5].mxu1 }
 0x263   : > { %v632_v4 = vmax.f32 %v624_v41, 0.0  ;;  %v613_v5 = vadd.f32 %v612_v3, %v529_v47 }
 0x264   : > { %639 = vst [vmem:[%s1410_s10 + $0x10] sm:$0xff] %v631_v1  ;;  %v625_v6 = vadd.f32 %v611_v2, %v1389_v54 }
 0x265   : > { %640 = vst [vmem:[%s1410_s10 + $0x18] sm:$0xff] %v632_v4  ;;  %v626_v7 = vadd.f32 %v613_v5, %v1384_v48  ;;  %v616_v8 = vpop.f32.mrb[6].mxu1 }
 0x266   : > { %v633_v39 = vmax.f32 %v625_v6, 0.0  ;;  %v617_v46 = vadd.f32 %v616_v8, %v525_v45  ;;  %v618_v9 = vpop.f32.mrb[7].mxu1 }
 0x267   : > { %v634_v10 = vmax.f32 %v626_v7, 0.0  ;;  %v619_v11 = vadd.f32 %v618_v9, %v529_v47 }
 0x268   : > { %641 = vst [vmem:[%s1410_s10 + $0x20] sm:$0xff] %v633_v39  ;;  %v627_v12 = vadd.f32 %v617_v46, %v1397_v62 }
 0x269   : > { %642 = vst [vmem:[%s1410_s10 + $0x28] sm:$0xff] %v634_v10  ;;  %v628_v48 = vadd.f32 %v619_v11, %v1392_v56 }
 0x26a   : > { %v635_v54 = vmax.f32 %v627_v12, 0.0 }
 0x26b   : > { %v636_v13 = vmax.f32 %v628_v48, 0.0 }
 0x26c   : > { %643 = vst [vmem:[%s1410_s10 + $0x30] sm:$0xff] %v635_v54 }
 0x26d   : > { %644 = vst [vmem:[%s1410_s10 + $0x38] sm:$0xff] %v636_v13 }
 0x26e   : > { %1074 = shalt.err (!%p1071_p1)
}
 0x26f   : > { %s1075_s12 = scalar_lea.hbm %s1431_s11, 1024  ;;  %s1079_s15 = scalar_lea.hbm %s1482_s5, 2048 }
 0x270   : > { %p1076_p13 = scmp.ne.s32.totalorder %s1431_s11, %s1075_s12  ;;  %p1080_p4 = scmp.lt.u32.totalorder %s1431_s11, %s1482_s5 }
 0x271   : > { %p1081_p5 = scmp.lt.u32.totalorder %s1079_s15, %s1075_s12  ;;  %p1083_p11 = scmp.lt.u32.totalorder %s1075_s12, %s1431_s11 }
 0x272   : > { %p1077_p6 = pnand %p1076_p13, %p1496_p0 }
 0x273   : > { %p1082_p8 = por %p1081_p5, %p1080_p4 }
 0x274   : > { %p1078_p10 = pneg %p1077_p6 }
 0x275   : > { %p1084_p2 = por %p1083_p11, %p1082_p8 }
 0x277   : > { %p1085_p3 = pnand %p1084_p2, %p1078_p10 }
 0x279   : > { %1088 = shalt.err (!%p1085_p3)
}
 0x27a   : > { %s1139_s13 = smov 256   ;;  %s1140_s9 = smov 16  }
 0x27b   : > { %914 = dma.vmem_to_hbm [thread:$0]  (%p1496_p0), %s1424_s28, 1024, %s1431_s11, %s646_s22, %s1139_s13, %s1139_s13, %s1140_s9  }
 0x27c PF: > { %s675_s30 = sand.u32 1, %s1119_s18   ;;  %p1497_p7 = scmp.ne.s32.totalorder %s1487_s25, 0 }
 0x27d   : > { %p1498_p9 = scmp.ge.s32.totalorder %s1131_s21, 2  ;;  %s676_s17 = scalar_lea.sflag [#allocation4], %s675_s30 }
 0x27f   : > { %p928_p12 = pnand %p1498_p9, %p1497_p7 }
 0x281   : > { %1114 = dma.done.wait (!%p928_p12), %s676_s17, 1024  }
 0x282   : > { %1116 = vsyncadd (!%p928_p12), %s676_s17, 4294966272  ;;  %p19_p1 = scmp.ge.s32.totalorder %s1287_s29, 4   ;;  %s1499_s18 = smov %s1123_s19 }
 0x283   : > { %s1500_s19 = smov %s1127_s20  ;;  %s1501_s20 = smov %s1303_s27 }
 0x284   : > { %s1502_s21 = smov %s1287_s29  ;;  %21 = sbr.rel (!%p19_p1) target bundleno = 6 (0x6), region = 93 }
 0x28b   :  { %681 = vsyncpa [#allocation3], 1 }
 0x28c   :  { %683 = vsyncpa [#allocation3 + $0x1], 1 }
 0x28d   :  { %684 = vsyncpa [#allocation6], 1 }
 0x28e   :  { %685 = vsyncpa [#allocation4], 1 }
 0x28f   :  { %687 = vsyncpa [#allocation4 + $0x1], 1 }

// kernel: tpu_custom_call.1
= control target key start
LH: loop header
LB: loop body
LE: loop exit
PB: predicated region body
PF: predicated region fallthrough
CT: control target
= control target key end

     0   :  { %10 = vsyncpa [#allocation3], 0  ;;  %s1477_s0 = inlined_call_operand.hbm [shape: f32[64,256], index: 0, kind: input, shape index: {}]   ;;  %s1478_s1 = inlined_call_operand.hbm [shape: f32[256,256], index: 1, kind: input, shape index: {}]   ;;  %s1479_s2 = inlined_call_operand.vmem [shape: f32[1,256], index: 2, kind: input, shape index: {}]   ;;  %s1480_s3 = inlined_call_operand.hbm [shape: f32[256,256], index: 3, kind: input, shape index: {}]   ;;  %s1481_s4 = inlined_call_operand.vmem [shape: f32[1,256], index: 4, kind: input, shape index: {}]   ;;  %s1482_s5 = inlined_call_operand.hbm [shape: f32[64,256], index: 5, kind: output, shape index: {}]  }
   0x1   :  { %12 = vsyncpa [#allocation3 + $0x1], 0 }
   0x2   :  { %13 = vsyncpa [#allocation6], 0 }
   0x3   :  { %14 = vsyncpa [#allocation4], 0 }
   0x4   :  { %16 = vsyncpa [#allocation4 + $0x1], 0  ;;  %s1171_s18 = smov 0   ;;  %s1173_s19 = smov 0  }
   0x5   :  { %s1175_s20 = smov 0   ;;  %s1177_s21 = smov 0  }
   0x6 LB: > { %s1192_s22 = sadd.s32 4294967295, %s1131_s21   ;;  %s752_s23 = sadd.s32 4294967294, %s1131_s21   ;;  %s1131_s21 = sphi %s1177_s21, %s1502_s21   ;;  %s1127_s20 = sphi %s1175_s20, %s1501_s20   ;;  %s1123_s19 = sphi %s1173_s19, %s1500_s19   ;;  %s1119_s18 = sphi %s1171_s18, %s1499_s18  }
   0x7   : > { %p42_p0 = scmp.ne.s32.totalorder %s1123_s19, %s1119_s18  ;;  %p1483_p1 = scmp.eq.s32.totalorder %s1192_s22, 0 }
   0x8   : > { %p156_p3 = scmp.eq.s32.totalorder %s752_s23, 1  ;;  %p753_p5 = scmp.ge.s32.totalorder %s1131_s21, 1 }
   0x9   : > { %p1201_p4 = por %p1483_p1, %p42_p0  ;;  %p163_p7 = scmp.lt.s32.totalorder %s1131_s21, 3 }
   0xa   : > { %p1206_p6 = por %p156_p3, %p42_p0  ;;  %s1133_s27 = smov [#allocation5]  }
   0xb   : > { %s1486_s24 = scalar_select %p1201_p4, 1, 0 }
   0xc   : > { %s1487_s25 = scalar_select %p1206_p6, 1, 0 }
   0xd   : > { %p1211_p8 = pnand %p753_p5, %p163_p7  ;;  %s175_s28 = sshll.u32 %s1133_s27, 4  ;;  %s1215_s28 = int_to_ptr.vmem [resolvable:$true] %s175_s28 }
   0xe   : > { %s1134_s30 = smov [#allocation7]   ;;  %s975_s9 = scalar_lea.hbm %s1478_s1, 8192 }
   0xf   : > { %p916_p9 = pneg %p1211_p8  ;;  %s191_s6 = sshll.u32 %s1134_s30, 4  ;;  %s1226_s6 = int_to_ptr.vmem [resolvable:$true] %s191_s6 }
  0x10   : > { %p976_p12 = scmp.ne.s32.totalorder %s1478_s1, %s975_s9  ;;  %p982_p5 = scmp.lt.u32.totalorder %s975_s9, %s1478_s1 }
  0x11   : > { %p1222_p11 = pnand %p916_p9, %p1483_p1 }
  0x13   : > { %p977_p13 = pneg %p1222_p11 }
  0x15   : > { %p978_p0 = pnand %p977_p13, %p976_p12 }
  0x17   : > { %p979_p3 = pneg %p978_p0 }
  0x19   : > { %p984_p7 = pnand %p982_p5, %p979_p3 }
  0x1b   : > { %987 = shalt.err (!%p984_p7)
}
  0x1c   : > { %s988_s14 = scalar_lea.vmem %s1215_s28, 8192  ;;  %p996_p2 = scmp.lt.s32.totalorder %s1215_s28, %s1215_s28 }
  0x1d   : > { %p989_p9 = scmp.ne.s32.totalorder %s1215_s28, %s988_s14  ;;  %p997_p12 = scmp.lt.s32.totalorder %s988_s14, %s988_s14 }
  0x1f   : > { %p991_p10 = pnand %p989_p9, %p977_p13  ;;  %p998_p0 = por %p997_p12, %p996_p2 }
  0x21   : > { %p992_p1 = pneg %p991_p10 }
  0x23   : > { %p999_p6 = pnand %p998_p0, %p992_p1 }
  0x25   : > { %1002 = shalt.err (!%p999_p6)
}
  0x26   : > { %s1135_s15 = smov 256   ;;  %s1136_s16 = smov 16  }
  0x27   : > { %919 = dma.hbm_to_vmem [thread:$0]  (!%p1222_p11), %s1478_s1, 8192, %s1215_s28, [#allocation6], %s1135_s15, %s1135_s15, %s1136_s16  }
  0x28   : > { %s1003_s7 = scalar_lea.hbm %s1480_s3, 8192 }
  0x29   : > { %p1004_p1 = scmp.ne.s32.totalorder %s1480_s3, %s1003_s7  ;;  %p1010_p10 = scmp.lt.u32.totalorder %s1003_s7, %s1480_s3 }
  0x2b   : > { %p1006_p2 = pnand %p1004_p1, %p977_p13 }
  0x2d   : > { %p1007_p6 = pneg %p1006_p2 }
  0x2f   : > { %p1012_p3 = pnand %p1010_p10, %p1007_p6 }
  0x31   : > { %1015 = shalt.err (!%p1012_p3)
}
  0x32   : > { %s1016_s28 = scalar_lea.vmem %s1226_s6, 8192  ;;  %p1024_p12 = scmp.lt.s32.totalorder %s1226_s6, %s1226_s6 }
  0x33   : > { %p1017_p5 = scmp.ne.s32.totalorder %s1226_s6, %s1016_s28  ;;  %p1025_p0 = scmp.lt.s32.totalorder %s1016_s28, %s1016_s28 }
  0x35   : > { %p1019_p7 = pnand %p1017_p5, %p977_p13  ;;  %p1026_p1 = por %p1025_p0, %p1024_p12 }
  0x37   : > { %p1020_p9 = pneg %p1019_p7 }
  0x39   : > { %p1027_p2 = pnand %p1026_p1, %p1020_p9 }
  0x3b   : > { %1030 = shalt.err (!%p1027_p2)
}
  0x3c   : > { %922 = dma.hbm_to_vmem [thread:$0]  (!%p1222_p11), %s1480_s3, 8192, %s1226_s6, [#allocation6], %s1135_s15, %s1135_s15, %s1136_s16  }
  0x3d   : > { %s1287_s29 = sadd.s32 1, %s1131_s21   ;;  %s29_s14 = sadd.s32 1, %s1127_s20 }
  0x3e   : > { %s26_s17 = ssub.s32 %s1131_s21, %s1287_s29  ;;  %p36_p13 = scmp.ne.s32.totalorder %s1127_s20, %s1123_s19 }
  0x3f   : > { %p27_p6 = scmp.eq.s32.totalorder %s26_s17, 0  ;;  %p37_p10 = scmp.eq.s32.totalorder %s1131_s21, 0 }
  0x40   : > { %p1490_p3 = scmp.eq.s32.totalorder %s1192_s22, 1  ;;  %p933_p7 = scmp.lt.s32.totalorder %s1131_s21, 2 }
  0x41   : > { %s1303_s27 = scalar_select %p27_p6, %s1127_s20, %s29_s14  }
  0x42   : > { %p1297_p5 = por %p1490_p3, %p36_p13  ;;  %p38_p9 = por %p37_p10, %p36_p13 }
  0x43   : > { %s208_s30 = sand.u32 1, %s1127_s20   ;;  %s773_s6 = sshll.u32 %s1131_s21, 10 }
  0x44   : > { %s1491_s23 = scalar_select %p1297_p5, 1, 0 }
  0x45   : > { %s757_s7 = sshll.u32 %s208_s30, 6  ;;  %s1310_s10 = scalar_lea.hbm %s1477_s0, %s773_s6 }
  0x46   : > { %s212_s11 = scalar_lea.vmem [#allocation2], %s757_s7  ;;  %p1314_p11 = pnand %p933_p7, %p38_p9 }
  0x47   : > { %s220_s28 = sshll.u32 %s212_s11, 4  ;;  %s1318_s13 = scalar_lea.sflag [#allocation3], %s208_s30  ;;  %s1312_s28 = int_to_ptr.vmem [resolvable:$true] %s220_s28 }
  0x48   : > { %s1031_s14 = scalar_lea.hbm %s1310_s10, 1024  ;;  %p1033_p0 = pneg %p1314_p11 }
  0x49   : > { %p1032_p12 = scmp.ne.s32.totalorder %s1310_s10, %s1031_s14  ;;  %s1036_s6 = scalar_lea.hbm %s1477_s0, 2048 }
  0x4a   : > { %p1037_p13 = scmp.lt.u32.totalorder %s1310_s10, %s1477_s0  ;;  %p1038_p6 = scmp.lt.u32.totalorder %s1036_s6, %s1031_s14 }
  0x4b   : > { %p1034_p1 = pnand %p1033_p0, %p1032_p12  ;;  %p1040_p3 = scmp.lt.u32.totalorder %s1031_s14, %s1310_s10 }
  0x4c   : > { %p1039_p10 = por %p1038_p6, %p1037_p13 }
  0x4d   : > { %p1035_p2 = pneg %p1034_p1 }
  0x4e   : > { %p1041_p7 = por %p1040_p3, %p1039_p10 }
  0x50   : > { %p1042_p9 = pnand %p1041_p7, %p1035_p2 }
  0x52   : > { %1045 = shalt.err (!%p1042_p9)
}
  0x53   : > { %s1046_s30 = scalar_lea.vmem %s1312_s28, 1024  ;;  %s1137_s11 = smov [#allocation2]  }
  0x54   : > { %p1047_p12 = scmp.ne.s32.totalorder %s1312_s28, %s1046_s30  ;;  %s1051_s17 = sshll.u32 %s1137_s11, 4  ;;  %s1052_s17 = int_to_ptr.vmem [resolvable:$false] %s1051_s17 }
  0x55   : > { %s1053_s7 = scalar_lea.vmem %s1052_s17, 2048  ;;  %p1054_p4 = scmp.lt.s32.totalorder %s1312_s28, %s1052_s17 }
  0x56   : > { %p1049_p1 = pnand %p1047_p12, %p1033_p0  ;;  %p1055_p13 = scmp.lt.s32.totalorder %s1053_s7, %s1046_s30 }
  0x58   : > { %p1050_p5 = pneg %p1049_p1  ;;  %p1056_p6 = por %p1055_p13, %p1054_p4 }
  0x5a   : > { %p1057_p10 = pnand %p1056_p6, %p1050_p5 }
  0x5c   : > { %1060 = shalt.err (!%p1057_p10)
}
  0x5d   : > { %926 = dma.hbm_to_vmem [thread:$0]  (!%p1314_p11), %s1310_s10, 1024, %s1312_s28, %s1318_s13, %s1135_s15, %s1135_s15, %s1136_s16  }
  0x5e   : > { %232 = sbr.rel (%p1211_p8) target bundleno = 636 (0x27c), region = 40  ;;  %s1352_s14 = sand.u32 (!%p1211_p8), 1, %s1123_s19  }
  0x5f   : > { %s762_s6 = sshll.u32 (!%p1211_p8), %s1352_s14, 6  ;;  %s235_s8 = scalar_lea.sflag (!%p1211_p8), [#allocation3], %s1352_s14 }
  0x60   : > { %s1358_s12 = scalar_lea.vmem (!%p1211_p8), [#allocation2], %s762_s6  ;;  %p1493_p4 = scmp.ne.s32.totalorder (!%p1211_p8), %s1486_s24, 0 }
  0x65   : > { %1106 = dma.done.wait (%p1493_p4), %s235_s8, 1024  }
  0x66   : > { %1108 = vsyncadd (%p1493_p4), %s235_s8, 4294966272  ;;  %p1494_p5 = scmp.eq.s32.totalorder %s1192_s22, 0 }
  0x68   : > { %1110 = dma.done.wait (%p1494_p5), [#allocation6], 16384   ;;  %p1495_p8 = pmov %p1494_p5 }
  0x69   : > { %v284_v0 = vld [vmem:[#allocation5 + $0x8] sm:$0xff]  ;;  %v286_v1 = vld [vmem:[#allocation5 + $0x18] sm:$0xff]  ;;  %v283_v2 = vld [vmem:[#allocation5] sm:$0xff]  ;;  %s1410_s10 = scalar_lea.vmem [#allocation8], %s762_s6  ;;  %s775_s13 = sshll.u32 %s1192_s22, 10 }
  0x6a   : > { %1112 = vsyncadd (%p1495_p8), [#allocation6], 4294950912  ;;  %v776_v3 = vpack.c.bf16 %v286_v1, %v284_v0  ;;  %v285_v4 = vld [vmem:[#allocation5 + $0x10] sm:$0xff]  ;;  %v288_v5 = vld [vmem:[#allocation5 + $0x28] sm:$0xff]  ;;  %s660_s28 = sshll.u32 %s1410_s10, 4  ;;  %s1431_s11 = scalar_lea.hbm %s1482_s5, %s775_s13  ;;  %s1424_s28 = int_to_ptr.vmem [resolvable:$true] %s660_s28 }
  0x6b   : > { %v290_v6 = vld [vmem:[#allocation5 + $0x38] sm:$0xff]  ;;  %v778_v7 = vpack.c.bf16 %v285_v4, %v283_v2  ;;  %v287_v9 = vld [vmem:[#allocation5 + $0x20] sm:$0xff]  ;;  %v289_v10 = vld [vmem:[#allocation5 + $0x30] sm:$0xff]  ;;  %s646_s22 = scalar_lea.sflag [#allocation4], %s1352_s14  ;;  %s1061_s17 = scalar_lea.vmem %s1424_s28, 1024 }
  0x6c   : > { %v780_v8 = vpack.c.bf16 %v290_v6, %v288_v5  ;;  %v292_v11 = vld [vmem:[#allocation5 + $0x48] sm:$0xff]  ;;  %777 = vmatprep.subr.bf16.mxu0 %v776_v3  ;;  %v294_v12 = vld [vmem:[#allocation5 + $0x58] sm:$0xff]  ;;  %v782_v13 = vpack.c.bf16 %v289_v10, %v287_v9  ;;  %v291_v15 = vld [vmem:[#allocation5 + $0x40] sm:$0xff]  ;;  %p1062_p11 = scmp.ne.s32.totalorder %s1424_s28, %s1061_s17  ;;  %p1496_p0 = scmp.ne.s32.totalorder %s1491_s23, 0 }
  0x6d   : > { %779 = vmatpush1.bf16.msra.mxu0 %v778_v7  ;;  %v784_v14 = vpack.c.bf16 %v294_v12, %v292_v11  ;;  %v293_v16 = vld [vmem:[#allocation5 + $0x50] sm:$0xff]  ;;  %v296_v17 = vld [vmem:[#allocation5 + $0x68] sm:$0xff]  ;;  %v298_v18 = vld [vmem:[#allocation5 + $0x78] sm:$0xff]  ;;  %s1138_s7 = smov [#allocation8]  }
  0x6e   : > { %781 = vmatprep.subr.bf16.mxu0 %v780_v8  ;;  %v786_v19 = vpack.c.bf16 %v293_v16, %v291_v15  ;;  %v788_v20 = vpack.c.bf16 %v298_v18, %v296_v17  ;;  %v295_v21 = vld [vmem:[#allocation5 + $0x60] sm:$0xff]  ;;  %v297_v22 = vld [vmem:[#allocation5 + $0x70] sm:$0xff]  ;;  %v300_v23 = vld [vmem:[#allocation5 + $0x88] sm:$0xff]  ;;  %p1063_p2 = pnand %p1062_p11, %p1496_p0  ;;  %s1065_s6 = sshll.u32 %s1138_s7, 4  ;;  %s1066_s6 = int_to_ptr.vmem [resolvable:$false] %s1065_s6 }
  0x6f   : > { %v302_v24 = vld [vmem:[#allocation5 + $0x98] sm:$0xff]  ;;  %v790_v25 = vpack.c.bf16 %v297_v22, %v295_v21  ;;  %v299_v27 = vld [vmem:[#allocation5 + $0x80] sm:$0xff]  ;;  %v301_v28 = vld [vmem:[#allocation5 + $0x90] sm:$0xff]  ;;  %s1067_s8 = scalar_lea.vmem %s1066_s6, 2048  ;;  %p1068_p7 = scmp.lt.s32.totalorder %s1424_s28, %s1066_s6 }
  0x70   : > { %v792_v26 = vpack.c.bf16 %v302_v24, %v300_v23  ;;  %v304_v29 = vld [vmem:[#allocation5 + $0xa8] sm:$0xff]  ;;  %v306_v30 = vld [vmem:[#allocation5 + $0xb8] sm:$0xff]  ;;  %v794_v31 = vpack.c.bf16 %v301_v28, %v299_v27  ;;  %v303_v33 = vld [vmem:[#allocation5 + $0xa0] sm:$0xff]  ;;  %p1064_p3 = pneg %p1063_p2  ;;  %p1069_p9 = scmp.lt.s32.totalorder %s1067_s8, %s1061_s17 }
  0x71   : > { %783 = vmatpush1.bf16.msra.mxu0 %v782_v13  ;;  %v796_v32 = vpack.c.bf16 %v306_v30, %v304_v29  ;;  %v305_v34 = vld [vmem:[#allocation5 + $0xb0] sm:$0xff]  ;;  %v308_v35 = vld [vmem:[#allocation5 + $0xc8] sm:$0xff]  ;;  %v310_v36 = vld [vmem:[#allocation5 + $0xd8] sm:$0xff] }
  0x72   : > { %785 = vmatprep.subr.bf16.mxu0 %v784_v14  ;;  %v798_v37 = vpack.c.bf16 %v305_v34, %v303_v33  ;;  %v800_v38 = vpack.c.bf16 %v310_v36, %v308_v35  ;;  %v307_v39 = vld [vmem:[#allocation5 + $0xc0] sm:$0xff]  ;;  %v309_v40 = vld [vmem:[#allocation5 + $0xd0] sm:$0xff]  ;;  %v1369_v41 = vld [vmem:[%s1358_s12 + $0x8] sm:$0xff]  ;;  %p1070_p12 = por %p1069_p9, %p1068_p7 }
  0x73   : > { %v312_v42 = vld [vmem:[#allocation5 + $0xe8] sm:$0xff]  ;;  %v314_v43 = vld [vmem:[#allocation5 + $0xf8] sm:$0xff]  ;;  %423 = vmatprep.mubr.f32.mxu0 %v1369_v41  ;;  %v311_v44 = vld [vmem:[#allocation5 + $0xe0] sm:$0xff]  ;;  %v802_v46 = vpack.c.bf16 %v309_v40, %v307_v39 }
  0x74   : > { %v313_v45 = vld [vmem:[#allocation5 + $0xf0] sm:$0xff]  ;;  %v316_v47 = vld [vmem:[#allocation5 + $0x108] sm:$0xff]  ;;  %v318_v48 = vld [vmem:[#allocation5 + $0x118] sm:$0xff]  ;;  %v804_v52 = vpack.c.bf16 %v314_v43, %v312_v42  ;;  %p1071_p1 = pnand %p1070_p12, %p1064_p3 }
  0x75   : > { %787 = vmatpush1.bf16.msra.mxu0 %v786_v19  ;;  %v457_v49 = vld [vmem:[#allocation7 + $0x8] sm:$0xff]  ;;  %v459_v50 = vld [vmem:[#allocation7 + $0x18] sm:$0xff]  ;;  %v456_v51 = vld [vmem:[#allocation7] sm:$0xff]  ;;  %v806_v63 = vpack.c.bf16 %v313_v45, %v311_v44  ;;  %v808_v3 = vpack.c.bf16 %v318_v48, %v316_v47 }
  0x76   : > { %789 = vmatprep.subr.bf16.mxu0 %v788_v20  ;;  %v840_v53 = vpack.c.bf16 %v459_v50, %v457_v49  ;;  %v458_v54 = vld [vmem:[#allocation7 + $0x10] sm:$0xff]  ;;  %v461_v55 = vld [vmem:[#allocation7 + $0x28] sm:$0xff]  ;;  %v463_v56 = vld [vmem:[#allocation7 + $0x38] sm:$0xff] }
  0x77   : > { %v842_v57 = vpack.c.bf16 %v458_v54, %v456_v51  ;;  %v844_v58 = vpack.c.bf16 %v463_v56, %v461_v55  ;;  %v460_v59 = vld [vmem:[#allocation7 + $0x20] sm:$0xff]  ;;  %v462_v60 = vld [vmem:[#allocation7 + $0x30] sm:$0xff]  ;;  %v465_v61 = vld [vmem:[#allocation7 + $0x48] sm:$0xff] }
  0x78   : > { %841 = vmatprep.subr.bf16.mxu1 %v840_v53  ;;  %v467_v62 = vld [vmem:[#allocation7 + $0x58] sm:$0xff]  ;;  %v315_v0 = vld [vmem:[#allocation5 + $0x100] sm:$0xff]  ;;  %v317_v1 = vld [vmem:[#allocation5 + $0x110] sm:$0xff]  ;;  %v846_v2 = vpack.c.bf16 %v462_v60, %v460_v59 }
  0x79   : > { %791 = vmatpush1.bf16.msra.mxu0 %v790_v25  ;;  %843 = vmatpush1.bf16.msra.mxu1 %v842_v57  ;;  %v320_v4 = vld [vmem:[#allocation5 + $0x128] sm:$0xff]  ;;  %v848_v5 = vpack.c.bf16 %v467_v62, %v465_v61  ;;  %v464_v6 = vld [vmem:[#allocation7 + $0x40] sm:$0xff]  ;;  %v466_v7 = vld [vmem:[#allocation7 + $0x50] sm:$0xff]  ;;  %v810_v11 = vpack.c.bf16 %v317_v1, %v315_v0 }
  0x7a   : > { %793 = vmatprep.subr.bf16.mxu0 %v792_v26  ;;  %845 = vmatprep.subr.bf16.mxu1 %v844_v58  ;;  %v322_v8 = vld [vmem:[#allocation5 + $0x138] sm:$0xff]  ;;  %v469_v9 = vld [vmem:[#allocation7 + $0x68] sm:$0xff]  ;;  %v319_v12 = vld [vmem:[#allocation5 + $0x120] sm:$0xff]  ;;  %v850_v14 = vpack.c.bf16 %v466_v7, %v464_v6 }
  0x7b   : > { %v471_v10 = vld [vmem:[#allocation7 + $0x78] sm:$0xff]  ;;  %v321_v13 = vld [vmem:[#allocation5 + $0x130] sm:$0xff]  ;;  %v812_v15 = vpack.c.bf16 %v322_v8, %v320_v4  ;;  %v324_v16 = vld [vmem:[#allocation5 + $0x148] sm:$0xff] }
  0x7c   : > { %v852_v17 = vpack.c.bf16 %v471_v10, %v469_v9  ;;  %v468_v18 = vld [vmem:[#allocation7 + $0x60] sm:$0xff]  ;;  %v470_v19 = vld [vmem:[#allocation7 + $0x70] sm:$0xff]  ;;  %v326_v20 = vld [vmem:[#allocation5 + $0x158] sm:$0xff]  ;;  %v814_v23 = vpack.c.bf16 %v321_v13, %v319_v12 }
  0x7d   : > { %795 = vmatpush1.bf16.msra.mxu0 %v794_v31  ;;  %847 = vmatpush1.bf16.msra.mxu1 %v846_v2  ;;  %v473_v21 = vld [vmem:[#allocation7 + $0x88] sm:$0xff]  ;;  %v475_v22 = vld [vmem:[#allocation7 + $0x98] sm:$0xff]  ;;  %v323_v24 = vld [vmem:[#allocation5 + $0x140] sm:$0xff]  ;;  %v854_v26 = vpack.c.bf16 %v470_v19, %v468_v18  ;;  %v816_v27 = vpack.c.bf16 %v326_v20, %v324_v16 }
  0x7e   : > { %797 = vmatprep.subr.bf16.mxu0 %v796_v32  ;;  %849 = vmatprep.subr.bf16.mxu1 %v848_v5  ;;  %v325_v25 = vld [vmem:[#allocation5 + $0x150] sm:$0xff]  ;;  %v328_v28 = vld [vmem:[#allocation5 + $0x168] sm:$0xff]  ;;  %v856_v29 = vpack.c.bf16 %v475_v22, %v473_v21  ;;  %v472_v30 = vld [vmem:[#allocation7 + $0x80] sm:$0xff] }
  0x7f   : > { %v474_v31 = vld [vmem:[#allocation7 + $0x90] sm:$0xff]  ;;  %v330_v32 = vld [vmem:[#allocation5 + $0x178] sm:$0xff]  ;;  %v477_v33 = vld [vmem:[#allocation7 + $0xa8] sm:$0xff]  ;;  %v818_v35 = vpack.c.bf16 %v325_v25, %v323_v24 }
  0x80   : > { %v479_v34 = vld [vmem:[#allocation7 + $0xb8] sm:$0xff]  ;;  %v327_v36 = vld [vmem:[#allocation5 + $0x160] sm:$0xff]  ;;  %v820_v39 = vpack.c.bf16 %v330_v32, %v328_v28  ;;  %v332_v40 = vld [vmem:[#allocation5 + $0x188] sm:$0xff] }
  0x81   : > { %799 = vmatpush1.bf16.msra.mxu0 %v798_v37  ;;  %851 = vmatpush1.bf16.msra.mxu1 %v850_v14  ;;  %v329_v37 = vld [vmem:[#allocation5 + $0x170] sm:$0xff]  ;;  %v860_v42 = vpack.c.bf16 %v479_v34, %v477_v33  ;;  %v476_v43 = vld [vmem:[#allocation7 + $0xa0] sm:$0xff]  ;;  %v334_v45 = vld [vmem:[#allocation5 + $0x198] sm:$0xff] }
  0x82   : > { %801 = vmatprep.subr.bf16.mxu0 %v800_v38  ;;  %853 = vmatprep.subr.bf16.mxu1 %v852_v17  ;;  %v858_v38 = vpack.c.bf16 %v474_v31, %v472_v30  ;;  %v478_v44 = vld [vmem:[#allocation7 + $0xb0] sm:$0xff]  ;;  %v483_v47 = vld [vmem:[#allocation7 + $0xd8] sm:$0xff]  ;;  %v822_v48 = vpack.c.bf16 %v329_v37, %v327_v36  ;;  %v331_v49 = vld [vmem:[#allocation5 + $0x180] sm:$0xff] }
  0x83   : > { %v333_v50 = vld [vmem:[#allocation5 + $0x190] sm:$0xff]  ;;  %v862_v51 = vpack.c.bf16 %v478_v44, %v476_v43  ;;  %v336_v53 = vld [vmem:[#allocation5 + $0x1a8] sm:$0xff]  ;;  %v480_v55 = vld [vmem:[#allocation7 + $0xc0] sm:$0xff] }
  0x84   : > { %v482_v56 = vld [vmem:[#allocation7 + $0xd0] sm:$0xff]  ;;  %v338_v57 = vld [vmem:[#allocation5 + $0x1b8] sm:$0xff]  ;;  %v485_v58 = vld [vmem:[#allocation7 + $0xe8] sm:$0xff]  ;;  %v826_v60 = vpack.c.bf16 %v333_v50, %v331_v49 }
  0x85   : > { %803 = vmatpush1.bf16.msra.mxu0 %v802_v46  ;;  %855 = vmatpush1.bf16.msra.mxu1 %v854_v26  ;;  %v481_v46 = vld [vmem:[#allocation7 + $0xc8] sm:$0xff]  ;;  %v487_v59 = vld [vmem:[#allocation7 + $0xf8] sm:$0xff]  ;;  %v335_v61 = vld [vmem:[#allocation5 + $0x1a0] sm:$0xff]  ;;  %v828_v0 = vpack.c.bf16 %v338_v57, %v336_v53 }
  0x86   : > { %805 = vmatprep.subr.bf16.mxu0 %v804_v52  ;;  %857 = vmatprep.subr.bf16.mxu1 %v856_v29  ;;  %v824_v52 = vpack.c.bf16 %v334_v45, %v332_v40  ;;  %v864_v54 = vpack.c.bf16 %v483_v47, %v481_v46  ;;  %v337_v62 = vld [vmem:[#allocation5 + $0x1b0] sm:$0xff]  ;;  %v340_v1 = vld [vmem:[#allocation5 + $0x1c8] sm:$0xff]  ;;  %v868_v2 = vpack.c.bf16 %v487_v59, %v485_v58  ;;  %v342_v5 = vld [vmem:[#allocation5 + $0x1d8] sm:$0xff] }
  0x87   : > { %v486_v4 = vld [vmem:[#allocation7 + $0xf0] sm:$0xff]  ;;  %v489_v6 = vld [vmem:[#allocation7 + $0x108] sm:$0xff]  ;;  %v491_v7 = vld [vmem:[#allocation7 + $0x118] sm:$0xff]  ;;  %v830_v8 = vpack.c.bf16 %v337_v62, %v335_v61  ;;  %v832_v12 = vpack.c.bf16 %v342_v5, %v340_v1 }
  0x88   : > { %v339_v9 = vld [vmem:[#allocation5 + $0x1c0] sm:$0xff]  ;;  %v341_v10 = vld [vmem:[#allocation5 + $0x1d0] sm:$0xff]  ;;  %v344_v13 = vld [vmem:[#allocation5 + $0x1e8] sm:$0xff]  ;;  %v872_v14 = vpack.c.bf16 %v491_v7, %v489_v6 }
  0x89   : > { %807 = vmatpush1.bf16.msra.mxu0 %v806_v63  ;;  %859 = vmatpush1.bf16.msra.mxu1 %v858_v38  ;;  %v866_v63 = vpack.c.bf16 %v482_v56, %v480_v55  ;;  %v490_v16 = vld [vmem:[#allocation7 + $0x110] sm:$0xff]  ;;  %v346_v17 = vld [vmem:[#allocation5 + $0x1f8] sm:$0xff]  ;;  %v493_v18 = vld [vmem:[#allocation7 + $0x128] sm:$0xff]  ;;  %v834_v20 = vpack.c.bf16 %v341_v10, %v339_v9  ;;  %v349_v10 = vlaneseq }
  0x8a   : > { %809 = vmatprep.subr.bf16.mxu0 %v808_v3  ;;  %861 = vmatprep.subr.bf16.mxu1 %v860_v42  ;;  %v484_v3 = vld [vmem:[#allocation7 + $0xe0] sm:$0xff]  ;;  %v495_v19 = vld [vmem:[#allocation7 + $0x138] sm:$0xff]  ;;  %v345_v24 = vld [vmem:[#allocation5 + $0x1f0] sm:$0xff] }
  0x8b   : > { %v343_v21 = vld [vmem:[#allocation5 + $0x1e0] sm:$0xff]  ;;  %v876_v25 = vpack.c.bf16 %v495_v19, %v493_v18  ;;  %v497_v28 = vld [vmem:[#allocation7 + $0x148] sm:$0xff]  ;;  %v499_v29 = vld [vmem:[#allocation7 + $0x158] sm:$0xff] }
  0x8c   : > { %v492_v26 = vld [vmem:[#allocation7 + $0x120] sm:$0xff]  ;;  %v838_v30 = vpack.c.bf16 %v345_v24, %v343_v21  ;;  %v880_v32 = vpack.c.bf16 %v499_v29, %v497_v28  ;;  %v498_v34 = vld [vmem:[#allocation7 + $0x150] sm:$0xff]  ;;  %v503_v36 = vld [vmem:[#allocation7 + $0x178] sm:$0xff] }
  0x8d   : > { %811 = vmatpush1.bf16.msra.mxu0 %v810_v11  ;;  %863 = vmatpush1.bf16.msra.mxu1 %v862_v51  ;;  %v870_v11 = vpack.c.bf16 %v486_v4, %v484_v3  ;;  %v496_v33 = vld [vmem:[#allocation7 + $0x140] sm:$0xff]  ;;  %v502_v43 = vld [vmem:[#allocation7 + $0x170] sm:$0xff]  ;;  %v505_v44 = vld [vmem:[#allocation7 + $0x188] sm:$0xff] }
  0x8e   : > { %813 = vmatprep.subr.bf16.mxu0 %v812_v15  ;;  %865 = vmatprep.subr.bf16.mxu1 %v864_v54  ;;  %v488_v15 = vld [vmem:[#allocation7 + $0x100] sm:$0xff]  ;;  %v882_v38 = vpack.c.bf16 %v498_v34, %v496_v33  ;;  %v507_v45 = vld [vmem:[#allocation7 + $0x198] sm:$0xff]  ;;  %v1381_v46 = vld [vmem:[%s1358_s12 + $0x10] sm:$0xff] }
  0x8f   : > { %v874_v22 = vpack.c.bf16 %v490_v16, %v488_v15  ;;  %v1373_v37 = vld [vmem:[%s1358_s12] sm:$0xff]  ;;  %v888_v49 = vpack.c.bf16 %v507_v45, %v505_v44  ;;  %v506_v51 = vld [vmem:[#allocation7 + $0x190] sm:$0xff]  ;;  %v511_v53 = vld [vmem:[#allocation7 + $0x1b8] sm:$0xff] }
  0x90   : > { %v500_v42 = vld [vmem:[#allocation7 + $0x160] sm:$0xff]  ;;  %v1392_v56 = vld [vmem:[%s1358_s12 + $0x38] sm:$0xff]  ;;  %v510_v59 = vld [vmem:[#allocation7 + $0x1b0] sm:$0xff] }
  0x91   : > { %815 = vmatpush1.bf16.msra.mxu0 %v814_v23  ;;  %867 = vmatpush1.bf16.msra.mxu1 %v866_v63  ;;  %v836_v23 = vpack.c.bf16 %v346_v17, %v344_v13  ;;  %v886_v47 = vpack.c.bf16 %v502_v43, %v500_v42  ;;  %v504_v50 = vld [vmem:[#allocation7 + $0x180] sm:$0xff]  ;;  %v515_v61 = vld [vmem:[#allocation7 + $0x1d8] sm:$0xff]  ;;  %v1397_v62 = vld [vmem:[%s1358_s12 + $0x30] sm:$0xff] }
  0x92   : > { %817 = vmatprep.subr.bf16.mxu0 %v816_v27  ;;  %869 = vmatprep.subr.bf16.mxu1 %v868_v2  ;;  %v494_v27 = vld [vmem:[#allocation7 + $0x130] sm:$0xff]  ;;  %v1389_v54 = vld [vmem:[%s1358_s12 + $0x20] sm:$0xff]  ;;  %v890_v55 = vpack.c.bf16 %v506_v51, %v504_v50  ;;  %v517_v4 = vld [vmem:[#allocation7 + $0x1e8] sm:$0xff] }
  0x93   : > { %v878_v31 = vpack.c.bf16 %v494_v27, %v492_v26  ;;  %v508_v58 = vld [vmem:[#allocation7 + $0x1a0] sm:$0xff]  ;;  %v514_v2 = vld [vmem:[#allocation7 + $0x1d0] sm:$0xff]  ;;  %v519_v5 = vld [vmem:[#allocation7 + $0x1f8] sm:$0xff] }
  0x94   : > { %v894_v63 = vpack.c.bf16 %v510_v59, %v508_v58  ;;  %v512_v1 = vld [vmem:[#allocation7 + $0x1c0] sm:$0xff]  ;;  %v900_v6 = vpack.c.bf16 %v519_v5, %v517_v4 }
  0x95   : > { %819 = vmatpush1.bf16.msra.mxu0 %v818_v35  ;;  %871 = vmatpush1.bf16.msra.mxu1 %v870_v11  ;;  %v501_v35 = vld [vmem:[#allocation7 + $0x168] sm:$0xff]  ;;  %v898_v3 = vpack.c.bf16 %v514_v2, %v512_v1  ;;  %v516_v7 = vld [vmem:[#allocation7 + $0x1e0] sm:$0xff]  ;;  %v350_v11 = vshrl.u32 %v349_v10, 7 }
  0x96   : > { %821 = vmatprep.subr.bf16.mxu0 %v820_v39  ;;  %873 = vmatprep.subr.bf16.mxu1 %v872_v14  ;;  %v1376_v39 = vld [vmem:[%s1358_s12 + $0x18] sm:$0xff]  ;;  %v884_v40 = vpack.c.bf16 %v503_v36, %v501_v35  ;;  %v347_v13 = vld [vmem:[%s1479_s2] sm:$0x3] }
  0x97   : > { %v355_v14 = vsub.s32 1, %v350_v11  ;;  %v520_v44 = vld [vmem:[%s1481_s4] sm:$0x3] }
  0x99   : > { %823 = vmatpush1.bf16.msra.mxu0 %v822_v48  ;;  %875 = vmatpush1.bf16.msra.mxu1 %v874_v22  ;;  %v1384_v48 = vld [vmem:[%s1358_s12 + $0x28] sm:$0xff]  ;;  %v356_v16 = vrot.slane %v347_v13, %v355_v14 }
  0x9a   : > { %825 = vmatprep.subr.bf16.mxu0 %v824_v52  ;;  %877 = vmatprep.subr.bf16.mxu1 %v876_v25  ;;  %v509_v52 = vld [vmem:[#allocation7 + $0x1a8] sm:$0xff] }
  0x9b   : > { %v892_v57 = vpack.c.bf16 %v511_v53, %v509_v52 }
  0x9d   : > { %827 = vmatpush1.bf16.msra.mxu0 %v826_v60  ;;  %879 = vmatpush1.bf16.msra.mxu1 %v878_v31  ;;  %v513_v60 = vld [vmem:[#allocation7 + $0x1c8] sm:$0xff] }
  0x9e   : > { %829 = vmatprep.subr.bf16.mxu0 %v828_v0  ;;  %881 = vmatprep.subr.bf16.mxu1 %v880_v32  ;;  %v896_v0 = vpack.c.bf16 %v515_v61, %v513_v60 }
  0xa1   : > { %831 = vmatpush1.bf16.msra.mxu0 %v830_v8  ;;  %883 = vmatpush1.bf16.msra.mxu1 %v882_v38  ;;  %v518_v8 = vld [vmem:[#allocation7 + $0x1f0] sm:$0xff] }
  0xa2   : > { %833 = vmatprep.subr.bf16.mxu0 %v832_v12  ;;  %885 = vmatprep.subr.bf16.mxu1 %v884_v40  ;;  %v902_v9 = vpack.c.bf16 %v518_v8, %v516_v7  ;;  %v351_v12 = vsub.s32 0, %v350_v11 }
  0xa4   : > { %v352_v15 = vrot.slane %v347_v13, %v351_v12  ;;  %v525_v45 = vrot.slane %v520_v44, %v351_v12 }
  0xa5   : > { %835 = vmatpush1.bf16.msra.mxu0 %v834_v20  ;;  %887 = vmatpush1.bf16.msra.mxu1 %v886_v47  ;;  %v529_v47 = vrot.slane %v520_v44, %v355_v14 }
  0xa6   : > { %837 = vmatprep.subr.bf16.mxu0 %v836_v23  ;;  %889 = vmatprep.subr.bf16.mxu1 %v888_v49 }
  0xa9   : > { %839 = vmatpush1.bf16.msra.mxu0 %v838_v30  ;;  %891 = vmatpush1.bf16.msra.mxu1 %v890_v55 }
  0xaa   : > { %893 = vmatprep.subr.bf16.mxu1 %v892_v57 }
  0xac   : > { %424 = vmatmul.mubr.f32.vlgmr.msra.gmra.mrb[0].mxu0 %v1373_v37 }
  0xad   : > { %429 = vmatprep.mubr.f32.mxu0 %v1376_v39  ;;  %895 = vmatpush1.bf16.msra.mxu1 %v894_v63 }
  0xae   : > { %897 = vmatprep.subr.bf16.mxu1 %v896_v0 }
  0xb0   : > { %430 = vmatmul.mubr.f32.gmra.mrb[2].mxu0 %v1381_v46 }
  0xb1   : > { %435 = vmatprep.mubr.f32.mxu0 %v1384_v48  ;;  %899 = vmatpush1.bf16.msra.mxu1 %v898_v3 }
  0xb2   : > { %901 = vmatprep.subr.bf16.mxu1 %v900_v6 }
  0xb4   : > { %436 = vmatmul.mubr.f32.gmra.mrb[4].mxu0 %v1389_v54 }
  0xb5   : > { %441 = vmatprep.mubr.f32.mxu0 %v1392_v56  ;;  %903 = vmatpush1.bf16.msra.mxu1 %v902_v9 }
  0xb8   : > { %442 = vmatmul.mubr.f32.gmra.mrb[6].mxu0 %v1397_v62 }
 0x17f   : > { %v425_v17 = vpop.f32.mrb[0].mxu0 }
 0x180   : > { %v426_v18 = vadd.f32 %v425_v17, %v352_v15  ;;  %v427_v19 = vpop.f32.mrb[1].mxu0 }
 0x181   : > { %v428_v20 = vadd.f32 %v427_v19, %v356_v16 }
 0x182   : > { %v448_v23 = vmax.f32 %v426_v18, 0.0 }
 0x183   : > { %v431_v21 = vpop.f32.mrb[2].mxu0  ;;  %v449_v22 = vmax.f32 %v428_v20, 0.0 }
 0x184   : > { %v432_v24 = vadd.f32 %v431_v21, %v352_v15  ;;  %v433_v25 = vpop.f32.mrb[3].mxu0 }
 0x185   : > { %v434_v26 = vadd.f32 %v433_v25, %v356_v16  ;;  %596 = vmatprep.mubr.f32.mxu1 %v449_v22 }
 0x186   : > { %597 = vmatmul.mubr.f32.vlgmr.msra.gmra.mrb[0].mxu1 %v448_v23  ;;  %v450_v29 = vmax.f32 %v432_v24, 0.0 }
 0x187   : > { %v451_v27 = vmax.f32 %v434_v26, 0.0  ;;  %v437_v28 = vpop.f32.mrb[4].mxu0 }
 0x188   : > { %v438_v30 = vadd.f32 %v437_v28, %v352_v15  ;;  %v439_v31 = vpop.f32.mrb[5].mxu0 }
 0x189   : > { %v440_v32 = vadd.f32 %v439_v31, %v356_v16  ;;  %602 = vmatprep.mubr.f32.mxu1 %v451_v27 }
 0x18a   : > { %603 = vmatmul.mubr.f32.gmra.mrb[2].mxu1 %v450_v29  ;;  %v452_v35 = vmax.f32 %v438_v30, 0.0 }
 0x18b   : > { %v453_v33 = vmax.f32 %v440_v32, 0.0  ;;  %v443_v34 = vpop.f32.mrb[6].mxu0 }
 0x18c   : > { %v444_v36 = vadd.f32 %v443_v34, %v352_v15  ;;  %v445_v38 = vpop.f32.mrb[7].mxu0 }
 0x18d   : > { %v446_v40 = vadd.f32 %v445_v38, %v356_v16  ;;  %608 = vmatprep.mubr.f32.mxu1 %v453_v33 }
 0x18e   : > { %609 = vmatmul.mubr.f32.gmra.mrb[4].mxu1 %v452_v35  ;;  %v454_v43 = vmax.f32 %v444_v36, 0.0 }
 0x18f   : > { %v455_v42 = vmax.f32 %v446_v40, 0.0 }
 0x191   : > { %614 = vmatprep.mubr.f32.mxu1 %v455_v42 }
 0x192   : > { %615 = vmatmul.mubr.f32.gmra.mrb[6].mxu1 %v454_v43 }
 0x259   : > { %v598_v49 = vpop.f32.mrb[0].mxu1 }
 0x25a   : > { %v599_v50 = vadd.f32 %v598_v49, %v525_v45  ;;  %v600_v51 = vpop.f32.mrb[1].mxu1 }
 0x25b   : > { %v601_v52 = vadd.f32 %v600_v51, %v529_v47 }
 0x25c   : > { %v621_v53 = vadd.f32 %v599_v50, %v1373_v37 }
 0x25d   : > { %v622_v55 = vadd.f32 %v601_v52, %v1369_v41  ;;  %v604_v57 = vpop.f32.mrb[2].mxu1 }
 0x25e   : > { %v629_v58 = vmax.f32 %v621_v53, 0.0  ;;  %v605_v59 = vadd.f32 %v604_v57, %v525_v45  ;;  %v606_v60 = vpop.f32.mrb[3].mxu1 }
 0x25f   : > { %v630_v61 = vmax.f32 %v622_v55, 0.0  ;;  %v607_v63 = vadd.f32 %v606_v60, %v529_v47 }
 0x260   : > { %637 = vst [vmem:[%s1410_s10] sm:$0xff] %v629_v58  ;;  %v623_v0 = vadd.f32 %v605_v59, %v1381_v46 }
 0x261   : > { %638 = vst [vmem:[%s1410_s10 + $0x8] sm:$0xff] %v630_v61  ;;  %v624_v41 = vadd.f32 %v607_v63, %v1376_v39  ;;  %v610_v37 = vpop.f32.mrb[4].mxu1 }
 0x262   : > { %v631_v1 = vmax.f32 %v623_v0, 0.0  ;;  %v611_v2 = vadd.f32 %v610_v37, %v525_v45  ;;  %v612_v3 = vpop.f32.mrb[5].mxu1 }
 0x263   : > { %v632_v4 = vmax.f32 %v624_v41, 0.0  ;;  %v613_v5 = vadd.f32 %v612_v3, %v529_v47 }
 0x264   : > { %639 = vst [vmem:[%s1410_s10 + $0x10] sm:$0xff] %v631_v1  ;;  %v625_v6 = vadd.f32 %v611_v2, %v1389_v54 }
 0x265   : > { %640 = vst [vmem:[%s1410_s10 + $0x18] sm:$0xff] %v632_v4  ;;  %v626_v7 = vadd.f32 %v613_v5, %v1384_v48  ;;  %v616_v8 = vpop.f32.mrb[6].mxu1 }
 0x266   : > { %v633_v39 = vmax.f32 %v625_v6, 0.0  ;;  %v617_v46 = vadd.f32 %v616_v8, %v525_v45  ;;  %v618_v9 = vpop.f32.mrb[7].mxu1 }
 0x267   : > { %v634_v10 = vmax.f32 %v626_v7, 0.0  ;;  %v619_v11 = vadd.f32 %v618_v9, %v529_v47 }
 0x268   : > { %641 = vst [vmem:[%s1410_s10 + $0x20] sm:$0xff] %v633_v39  ;;  %v627_v12 = vadd.f32 %v617_v46, %v1397_v62 }
 0x269   : > { %642 = vst [vmem:[%s1410_s10 + $0x28] sm:$0xff] %v634_v10  ;;  %v628_v48 = vadd.f32 %v619_v11, %v1392_v56 }
 0x26a   : > { %v635_v54 = vmax.f32 %v627_v12, 0.0 }
 0x26b   : > { %v636_v13 = vmax.f32 %v628_v48, 0.0 }
 0x26c   : > { %643 = vst [vmem:[%s1410_s10 + $0x30] sm:$0xff] %v635_v54 }
 0x26d   : > { %644 = vst [vmem:[%s1410_s10 + $0x38] sm:$0xff] %v636_v13 }
 0x26e   : > { %1074 = shalt.err (!%p1071_p1)
}
 0x26f   : > { %s1075_s12 = scalar_lea.hbm %s1431_s11, 1024  ;;  %s1079_s15 = scalar_lea.hbm %s1482_s5, 2048 }
 0x270   : > { %p1076_p13 = scmp.ne.s32.totalorder %s1431_s11, %s1075_s12  ;;  %p1080_p4 = scmp.lt.u32.totalorder %s1431_s11, %s1482_s5 }
 0x271   : > { %p1081_p5 = scmp.lt.u32.totalorder %s1079_s15, %s1075_s12  ;;  %p1083_p11 = scmp.lt.u32.totalorder %s1075_s12, %s1431_s11 }
 0x272   : > { %p1077_p6 = pnand %p1076_p13, %p1496_p0 }
 0x273   : > { %p1082_p8 = por %p1081_p5, %p1080_p4 }
 0x274   : > { %p1078_p10 = pneg %p1077_p6 }
 0x275   : > { %p1084_p2 = por %p1083_p11, %p1082_p8 }
 0x277   : > { %p1085_p3 = pnand %p1084_p2, %p1078_p10 }
 0x279   : > { %1088 = shalt.err (!%p1085_p3)
}
 0x27a   : > { %s1139_s13 = smov 256   ;;  %s1140_s9 = smov 16  }
 0x27b   : > { %914 = dma.vmem_to_hbm [thread:$0]  (%p1496_p0), %s1424_s28, 1024, %s1431_s11, %s646_s22, %s1139_s13, %s1139_s13, %s1140_s9  }
 0x27c PF: > { %s675_s30 = sand.u32 1, %s1119_s18   ;;  %p1497_p7 = scmp.ne.s32.totalorder %s1487_s25, 0 }
 0x27d   : > { %p1498_p9 = scmp.ge.s32.totalorder %s1131_s21, 2  ;;  %s676_s17 = scalar_lea.sflag [#allocation4], %s675_s30 }
 0x27f   : > { %p928_p12 = pnand %p1498_p9, %p1497_p7 }
 0x281   : > { %1114 = dma.done.wait (!%p928_p12), %s676_s17, 1024  }
 0x282   : > { %1116 = vsyncadd (!%p928_p12), %s676_s17, 4294966272  ;;  %p19_p1 = scmp.ge.s32.totalorder %s1287_s29, 4   ;;  %s1499_s18 = smov %s1123_s19 }
 0x283   : > { %s1500_s19 = smov %s1127_s20  ;;  %s1501_s20 = smov %s1303_s27 }
 0x284   : > { %s1502_s21 = smov %s1287_s29  ;;  %21 = sbr.rel (!%p19_p1) target bundleno = 6 (0x6), region = 93 }
 0x28b   :  { %681 = vsyncpa [#allocation3], 1 }
 0x28c   :  { %683 = vsyncpa [#allocation3 + $0x1], 1 }
 0x28d   :  { %684 = vsyncpa [#allocation6], 1 }
 0x28e   :  { %685 = vsyncpa [#allocation4], 1 }
 0x28f   :  { %687 = vsyncpa [#allocation4 + $0x1], 1 }

</bundles_post_ra>
